<compile_context>
chip_gen: v7x
topology: tpu7x:2x2x1
jax: 0.10.0
libtpu: 0.0.40
codegen_flags: <defaults>
</compile_context>

<pallas_src>
import functools

import jax
import jax.numpy as jnp
from jax.experimental import pallas as pl
from jax.experimental.pallas import tpu as pltpu

_MiB = 1024 * 1024


# ---------------------------------------------------------------------------
# helpers
# ---------------------------------------------------------------------------
def _round_up(x, m):
    return ((x + m - 1) // m) * m


def _pad2d(x, rows, cols):
    r, c = x.shape
    if r == rows and c == cols:
        return x
    return jnp.pad(x, ((0, rows - r), (0, cols - c)))


def _pick_tile(dim, pref):
    """Largest tile <= pref that divides `dim` (dim is a multiple of 128)."""
    t = min(pref, dim)
    while dim % t != 0:
        t //= 2
    return max(t, 128)


@functools.lru_cache(maxsize=1)
def _tpu_info():
    """Best-effort (physical VMEM bytes per TensorCore, TensorCores per chip)."""
    kind = ""
    try:
        kind = jax.devices()[0].device_kind.lower()
    except Exception:
        pass
    vmem = None
    try:
        v = int(getattr(pltpu.get_tpu_info(), "vmem_capacity_bytes", 0))
        vmem = v if v > 0 else None
    except Exception:
        vmem = None
    if vmem is None:
        if ("v4" in kind) or ("v5" in kind) or ("v6" in kind):
            vmem = 128 * _MiB          # v4 / v5e / v5p / v6e physical VMEM
        else:
            vmem = 64 * _MiB           # v7x and unknown: conservative
    vmem = min(vmem, 128 * _MiB)
    cores = 2 if ("v7" in kind or "7x" in kind) else 1
    return vmem, cores


# ---------------------------------------------------------------------------
# Fused GNN layer:  out = relu( adj @ (x @ W) )   [optionally + fused z head]
# ---------------------------------------------------------------------------
def _fused_gnn_kernel(x_hbm, w_ref, adj_ref, o_ref,
                      x_vmem, support_ref, sem, *, copy_x_once):
    j = pl.program_id(0)   # output-column tile (parallel)
    i = pl.program_id(1)   # adjacency row block (arbitrary: scratch-carried)

    # x lives in HBM (memory_space=ANY); DMA it into a SINGLE (not
    # double-buffered) VMEM scratch. With one core (or one column tile) it is
    # copied exactly once for the whole layer.
    copy_cond = jnp.logical_and(i == 0, j == 0) if copy_x_once else (i == 0)

    @pl.when(copy_cond)
    def _():
        cp = pltpu.make_async_copy(x_hbm, x_vmem, sem)
        cp.start()
        cp.wait()

    # support[:, j] = x @ W[:, j], computed once per column tile, resident in
    # VMEM for all adjacency row blocks of this column tile.
    @pl.when(i == 0)
    def _():
        support_ref[...] = jnp.dot(
            x_vmem[...], w_ref[...], preferred_element_type=jnp.float32
        ).astype(support_ref.dtype)

    out = jnp.dot(adj_ref[...], support_ref[...],
                  preferred_element_type=jnp.float32)
    o_ref[...] = jnp.maximum(out, 0.0).astype(o_ref.dtype)


def _fused_gnn_z_kernel(x_hbm, w_ref, adj_ref, wz_ref, bz_ref,
                        h_ref, z_ref, x_vmem, support_ref, sem):
    # Single-column-tile variant with the z = h @ WzT + bz head fused into the
    # epilogue (used when the layer width fits one 128-lane column tile).
    i = pl.program_id(1)

    @pl.when(i == 0)
    def _():
        cp = pltpu.make_async_copy(x_hbm, x_vmem, sem)
        cp.start()
        cp.wait()
        support_ref[...] = jnp.dot(
            x_vmem[...], w_ref[...], preferred_element_type=jnp.float32
        ).astype(support_ref.dtype)

    h = jnp.maximum(
        jnp.dot(adj_ref[...], support_ref[...],
                preferred_element_type=jnp.float32),
        0.0,
    )
    h_ref[...] = h.astype(h_ref.dtype)
    z = jnp.dot(h.astype(wz_ref.dtype), wz_ref[...],
                preferred_element_type=jnp.float32) + bz_ref[...]
    z_ref[...] = z.astype(z_ref.dtype)


def _fused_gnn_layer_padded(x_p, adj_p, w_p, *, out_dtype, wz_p=None, bz_p=None,
                            tm_pref=256, tn_pref=256):
    """Fused single-pallas_call GNN layer on padded arrays.

    Returns (h_p, z_p_or_None) or None when the fused path should not be used
    (footprint over budget, or megacore would be under-utilized).
    """
    vmem_phys, num_cores = _tpu_info()
    n_pad, k_pad = x_p.shape
    d_pad = w_p.shape[1]
    cdt = x_p.dtype
    isz = jnp.dtype(cdt).itemsize
    osz = jnp.dtype(out_dtype).itemsize

    tm = _pick_tile(n_pad, tm_pref)
    tn = _pick_tile(d_pad, tn_pref)
    # Only split the (parallel) column axis on megacore chips; on single-TC
    # v5e/v6e an extra column tile just re-reads the N x N adjacency from HBM.
    if num_cores >= 2 and d_pad // tn < 2 and d_pad // 128 >= 2:
        tn = 128
    n_cols = d_pad // tn
    n_rows = n_pad // tm

    fuse_z = (wz_p is not None) and (bz_p is not None) and (n_cols == 1)
    nz_pad = wz_p.shape[1] if wz_p is not None else 0

    fused_vmem = (
        n_pad * k_pad * isz          # resident x copy (single-buffered scratch)
        + n_pad * tn * isz           # resident support column tile
        + 2 * k_pad * tn * isz       # W column tile (double-buffered)
        + 2 * tm * n_pad * isz       # adj row block (double-buffered)
        + 2 * tm * tn * osz          # h output tile (double-buffered)
    )
    if fuse_z:
        fused_vmem += (2 * tm * nz_pad * osz        # z output tile
                       + 2 * d_pad * nz_pad * isz   # resident Wz^T
                       + 2 * nz_pad * 4)            # bias row
    budget = int(0.75 * vmem_phys)   # 96 MiB on v5e/v6e, 48 MiB on v7x

    # v7x: a single-column-tile fused layer leaves one TensorCore idle; for
    # large graphs the two-matmul fallback (fully parallel grid) wins there.
    prefer_fallback = (num_cores >= 2 and n_cols == 1 and n_pad >= 2048)
    if fused_vmem > budget or prefer_fallback:
        return None

    copy_x_once = (num_cores == 1) or (n_cols == 1)
    vmem_limit = int(min(0.9 * vmem_phys, max(fused_vmem + 8 * _MiB, 32 * _MiB)))

    flops = 2 * n_pad * k_pad * d_pad + 2 * n_pad * n_pad * d_pad
    bytes_acc = (
        n_pad * k_pad * isz * (1 if copy_x_once else n_cols)
        + k_pad * d_pad * isz
        + n_pad * n_pad * isz * n_cols     # adj re-read once per column tile
        + n_pad * d_pad * osz
    )
    if fuse_z:
        flops += 2 * n_pad * d_pad * nz_pad
        bytes_acc += d_pad * nz_pad * isz + nz_pad * 4 + n_pad * nz_pad * osz
    cost = pl.CostEstimate(flops=int(flops), transcendentals=0,
                           bytes_accessed=int(bytes_acc))

    grid = (n_cols, n_rows)
    x_spec = pl.BlockSpec(memory_space=pl.ANY)            # raw HBM ref
    w_spec = pl.BlockSpec((k_pad, tn), lambda j, i: (0, j))
    adj_spec = pl.BlockSpec((tm, n_pad), lambda j, i: (i, 0))
    h_spec = pl.BlockSpec((tm, tn), lambda j, i: (i, j))
    scratch = [
        pltpu.VMEM((n_pad, k_pad), cdt),   # resident x
        pltpu.VMEM((n_pad, tn), cdt),      # resident support column tile
        pltpu.SemaphoreType.DMA,
    ]
    cparams = pltpu.CompilerParams(
        dimension_semantics=("parallel", "arbitrary"),
        vmem_limit_bytes=vmem_limit,
    )

    if fuse_z:
        h_p, z_p = pl.pallas_call(
            _fused_gnn_z_kernel,
            out_shape=(jax.ShapeDtypeStruct((n_pad, d_pad), out_dtype),
                       jax.ShapeDtypeStruct((n_pad, nz_pad), out_dtype)),
            grid_spec=pltpu.PrefetchScalarGridSpec(
                num_scalar_prefetch=0,
                grid=grid,
                in_specs=[x_spec, w_spec, adj_spec,
                          pl.BlockSpec((d_pad, nz_pad), lambda j, i: (0, 0)),
                          pl.BlockSpec((1, nz_pad), lambda j, i: (0, 0))],
                out_specs=(h_spec,
                           pl.BlockSpec((tm, nz_pad), lambda j, i: (i, 0))),
                scratch_shapes=scratch,
            ),
            compiler_params=cparams,
            cost_estimate=cost,
        )(x_p, w_p, adj_p, wz_p, bz_p)
        return h_p, z_p

    h_p = pl.pallas_call(
        functools.partial(_fused_gnn_kernel, copy_x_once=copy_x_once),
        out_shape=jax.ShapeDtypeStruct((n_pad, d_pad), out_dtype),
        grid_spec=pltpu.PrefetchScalarGridSpec(
            num_scalar_prefetch=0,
            grid=grid,
            in_specs=[x_spec, w_spec, adj_spec],
            out_specs=h_spec,
            scratch_shapes=scratch,
        ),
        compiler_params=cparams,
        cost_estimate=cost,
    )(x_p, w_p, adj_p)
    return h_p, None


# ---------------------------------------------------------------------------
# Generic tiled matmul on pre-padded arrays (+ optional bias / relu)
# ---------------------------------------------------------------------------
def _mm_kernel(a_ref, b_ref, o_ref, *, relu):
    out = jnp.dot(a_ref[...], b_ref[...], preferred_element_type=jnp.float32)
    if relu:
        out = jnp.maximum(out, 0.0)
    o_ref[...] = out.astype(o_ref.dtype)


def _mm_bias_kernel(a_ref, b_ref, bias_ref, o_ref, *, relu):
    out = jnp.dot(a_ref[...], b_ref[...], preferred_element_type=jnp.float32)
    out = out + bias_ref[...]
    if relu:
        out = jnp.maximum(out, 0.0)
    o_ref[...] = out.astype(o_ref.dtype)


def _mm_acc_kernel(a_ref, b_ref, o_ref, acc_ref, *, relu):
    @pl.when(pl.program_id(2) == 0)
    def _():
        acc_ref[...] = jnp.zeros_like(acc_ref)

    acc_ref[...] += jnp.dot(a_ref[...], b_ref[...],
                            preferred_element_type=jnp.float32)

    @pl.when(pl.program_id(2) == pl.num_programs(2) - 1)
    def _():
        out = acc_ref[...]
        if relu:
            out = jnp.maximum(out, 0.0)
        o_ref[...] = out.astype(o_ref.dtype)


def _mm_bias_acc_kernel(a_ref, b_ref, bias_ref, o_ref, acc_ref, *, relu):
    @pl.when(pl.program_id(2) == 0)
    def _():
        acc_ref[...] = jnp.zeros_like(acc_ref)

    acc_ref[...] += jnp.dot(a_ref[...], b_ref[...],
                            preferred_element_type=jnp.float32)

    @pl.when(pl.program_id(2) == pl.num_programs(2) - 1)
    def _():
        out = acc_ref[...] + bias_ref[...]
        if relu:
            out = jnp.maximum(out, 0.0)
        o_ref[...] = out.astype(o_ref.dtype)


def _matmul_padded(a, b, bias=None, *, relu=False, out_dtype=None,
                   tm=512, tn=512, tk=512):
    """out = a @ b (+ bias)(relu); every dim already a multiple of 128."""
    M, K = a.shape
    K2, N = b.shape
    assert K == K2, "inner dims must match"
    out_dtype = out_dtype if out_dtype is not None else a.dtype

    vmem_phys, _ = _tpu_info()
    tm = _pick_tile(M, tm)
    tn = _pick_tile(N, tn)
    tk = _pick_tile(K, tk)
    isz = jnp.dtype(a.dtype).itemsize
    osz = jnp.dtype(out_dtype).itemsize

    def footprint(tm_, tn_, tk_, nk_):
        f = 2 * (tm_ * tk_ + tk_ * tn_) * isz + 2 * tm_ * tn_ * osz
        if nk_ > 1:
            f += tm_ * tn_ * 4
        return f

    if footprint(tm, tn, tk, K // tk) > int(0.4 * vmem_phys):
        tm = _pick_tile(M, min(tm, 256))
        tn = _pick_tile(N, min(tn, 256))
        tk = _pick_tile(K, min(tk, 256))
    nk = K // tk
    vmem_limit = int(min(0.9 * vmem_phys,
                         max(footprint(tm, tn, tk, nk) + 8 * _MiB, 32 * _MiB)))

    operands = [a, b]
    in_specs = [
        pl.BlockSpec((tm, tk), lambda i, j, k: (i, k)),
        pl.BlockSpec((tk, tn), lambda i, j, k: (k, j)),
    ]
    if bias is not None:
        operands.append(bias)                       # (1, N), float32, padded
        in_specs.append(pl.BlockSpec((1, tn), lambda i, j, k: (0, j)))
        kernel_fn = _mm_bias_acc_kernel if nk > 1 else _mm_bias_kernel
    else:
        kernel_fn = _mm_acc_kernel if nk > 1 else _mm_kernel
    kernel = functools.partial(kernel_fn, relu=relu)
    scratch = [pltpu.VMEM((tm, tn), jnp.float32)] if nk > 1 else []

    cost = pl.CostEstimate(
        flops=int(2 * M * N * K), transcendentals=0,
        bytes_accessed=int((M * K + K * N) * isz + M * N * osz))

    return pl.pallas_call(
        kernel,
        out_shape=jax.ShapeDtypeStruct((M, N), out_dtype),
        grid_spec=pltpu.PrefetchScalarGridSpec(
            num_scalar_prefetch=0,
            grid=(M // tm, N // tn, nk),
            in_specs=in_specs,
            out_specs=pl.BlockSpec((tm, tn), lambda i, j, k: (i, j)),
            scratch_shapes=scratch,
        ),
        compiler_params=pltpu.CompilerParams(
            dimension_semantics=("parallel", "parallel", "arbitrary"),
            vmem_limit_bytes=vmem_limit,
        ),
        cost_estimate=cost,
    )(*operands)


# ---------------------------------------------------------------------------
# GCN encoder forward
# ---------------------------------------------------------------------------
def _gnn_layer_padded(x_p, adj_p, w_p, *, out_dtype, wz_p=None, bz_p=None):
    fused = _fused_gnn_layer_padded(x_p, adj_p, w_p, out_dtype=out_dtype,
                                    wz_p=wz_p, bz_p=bz_p)
    if fused is not None:
        return fused
    # Fallback: two tiled matmuls (support round-trips HBM in compute dtype).
    # Used for very large graphs or big-N single-column layers on megacore.
    support_p = _matmul_padded(x_p, w_p, out_dtype=x_p.dtype)
    h_p = _matmul_padded(adj_p, support_p, relu=True, out_dtype=out_dtype)
    return h_p, None


def gcn_encoder_forward(x, adj, params, *, compute_dtype=jnp.bfloat16):
    """enc_h1, enc_h2, z — same semantics as the PyTorch GCN_encoder.

    MXU operands default to bf16 with f32 accumulation (the resident `support`
    scratch is also bf16 — source of the looser tolerance); pass
    compute_dtype=jnp.float32 for a full-precision path.
    """
    N, n_input = x.shape
    n_enc_1 = params["w1"].shape[1]
    n_enc_2 = params["w2"].shape[1]
    n_z = params["wz_t"].shape[1]
    out_dtype = x.dtype
    cdt = jnp.dtype(compute_dtype)

    n_pad = _round_up(N, 128)
    k0_pad = _round_up(n_input, 128)
    d1_pad = _round_up(n_enc_1, 128)
    d2_pad = _round_up(n_enc_2, 128)
    nz_pad = _round_up(n_z, 128)

    # Pad once; all kernels consume/produce padded, lane-dense arrays and we
    # slice back to logical shapes exactly once at the end.
    x_p = _pad2d(x, n_pad, k0_pad).astype(cdt)
    adj_p = _pad2d(adj, n_pad, n_pad).astype(cdt)
    w1_p = _pad2d(params["w1"], k0_pad, d1_pad).astype(cdt)
    w2_p = _pad2d(params["w2"], d1_pad, d2_pad).astype(cdt)
    wz_p = _pad2d(params["wz_t"], d2_pad, nz_pad).astype(cdt)
    bz_p = jnp.pad(params["bz"].astype(jnp.float32),
                   (0, nz_pad - n_z)).reshape(1, nz_pad)

    h1_p, _ = _gnn_layer_padded(x_p, adj_p, w1_p, out_dtype=out_dtype)
    h1_cdt = h1_p if h1_p.dtype == cdt else h1_p.astype(cdt)

    # Layer 2 with the z = enc_h2 @ WzT + bz head fused into its epilogue when
    # n_enc_2 fits one column tile (the common case).
    h2_p, z_p = _gnn_layer_padded(h1_cdt, adj_p, w2_p, out_dtype=out_dtype,
                                  wz_p=wz_p, bz_p=bz_p)
    if z_p is None:
        h2_cdt = h2_p if h2_p.dtype == cdt else h2_p.astype(cdt)
        z_p = _matmul_padded(h2_cdt, wz_p, bias=bz_p, out_dtype=out_dtype)

    return h1_p[:N, :n_enc_1], h2_p[:N, :n_enc_2], z_p[:N, :n_z]


def init_params(key, n_input, n_enc_1, n_enc_2, n_z, dtype=jnp.float32):
    k1, k2, k3, k4 = jax.random.split(key, 4)

    def xavier(k, fan_in, fan_out):
        lim = jnp.sqrt(6.0 / (fan_in + fan_out))
        return jax.random.uniform(k, (fan_in, fan_out), dtype, -lim, lim)

    # torch Linear default init: U(-1/sqrt(fan_in), 1/sqrt(fan_in)).
    # Wz stored pre-transposed as [n_enc_2, n_z] so no .T per forward.
    lim_z = 1.0 / jnp.sqrt(float(n_enc_2))
    return {
        "w1": xavier(k1, n_input, n_enc_1),
        "w2": xavier(k2, n_enc_1, n_enc_2),
        "wz_t": jax.random.uniform(k3, (n_enc_2, n_z), dtype, -lim_z, lim_z),
        "bz": jax.random.uniform(k4, (n_z,), dtype, -lim_z, lim_z),
    }


if __name__ == "__main__":
    # x: [num_nodes, n_input], adj: [num_nodes, num_nodes]
    num_nodes, n_input, n_enc_1, n_enc_2, n_z = 256, 128, 128, 128, 64

    key = jax.random.PRNGKey(0)
    kx, ka, kp = jax.random.split(key, 3)

    x = jax.random.normal(kx, (num_nodes, n_input), jnp.float32)
    # Symmetric row-normalized adjacency with self loops (dense).
    a = (jax.random.uniform(ka, (num_nodes, num_nodes)) < 0.05).astype(jnp.float32)
    a = jnp.maximum(a, a.T) + jnp.eye(num_nodes, dtype=jnp.float32)
    adj = a / jnp.sum(a, axis=1, keepdims=True)

    params = init_params(kp, n_input, n_enc_1, n_enc_2, n_z)

    # Plain-JAX reference.
    r1 = jnp.maximum(adj @ (x @ params["w1"]), 0.0)
    r2 = jnp.maximum(adj @ (r1 @ params["w2"]), 0.0)
    rz = r2 @ params["wz_t"] + params["bz"]

    # Full-precision opt-in path: tight tolerance.
    fwd_f32 = jax.jit(functools.partial(gcn_encoder_forward,
                                        compute_dtype=jnp.float32))
    e1, e2, z = jax.block_until_ready(fwd_f32(x, adj, params))
    assert jnp.allclose(e1, r1, atol=1e-4, rtol=1e-4)
    assert jnp.allclose(e2, r2, atol=1e-4, rtol=1e-4)
    assert jnp.allclose(z, rz, atol=1e-4, rtol=1e-4)

    # Default path: bf16 MXU operands + f32 accumulation (looser tolerance —
    # operands and the resident support scratch are rounded to bf16).
    fwd = jax.jit(gcn_encoder_forward)
    b1, b2, bz_out = jax.block_until_ready(fwd(x, adj, params))
    assert jnp.allclose(b1, r1, atol=5e-2, rtol=5e-2)
    assert jnp.allclose(b2, r2, atol=5e-2, rtol=5e-2)
    assert jnp.allclose(bz_out, rz, atol=5e-2, rtol=5e-2)

    print("KERNEL_OK")
</pallas_src>

<mosaic_0001>
module attributes {stable_mosaic.version = 11 : i64} {
  func.func @_fused_gnn_kernel(%arg0: i32, %arg1: i32, %arg2: memref<256x128xf32, #tpu.memory_space<any>>, %arg3: memref<128x128xf32, #tpu.memory_space<vmem>>, %arg4: memref<256x256xf32, #tpu.memory_space<vmem>>, %arg5: memref<256x128xf32, #tpu.memory_space<vmem>>, %arg6: memref<256x128xf32, #tpu.memory_space<vmem>>, %arg7: memref<256x128xf32, #tpu.memory_space<vmem>>, %arg8: memref<!tpu.dma_semaphore, #tpu.memory_space<semaphore_mem>>) attributes {dimension_semantics = [#tpu.dimension_semantics<parallel>, #tpu.dimension_semantics<arbitrary>], iteration_bounds = array<i64: 1, 1>, scalar_prefetch = 0 : i64, scratch_operands = 3 : i64, tpu.core_type = #tpu.core_type<tc>, window_params = [{}, {transform_indices = @transform_1, window_bounds = array<i64: 128, 128>}, {transform_indices = @transform_2, window_bounds = array<i64: 256, 256>}, {transform_indices = @transform_3, window_bounds = array<i64: 256, 128>}]} {
    %c0_i32 = arith.constant 0 : i32
    %0 = arith.cmpi eq, %arg1, %c0_i32 : i32
    %c0_i32_0 = arith.constant 0 : i32
    %1 = arith.cmpi eq, %arg0, %c0_i32_0 : i32
    %2 = arith.andi %0, %1 : i1
    %3 = arith.extui %2 : i1 to i32
    %c0_i32_1 = arith.constant 0 : i32
    %4 = arith.cmpi ne, %3, %c0_i32_1 : i32
    scf.if %4 {
      tpu.enqueue_dma source(%arg2 : memref<256x128xf32, #tpu.memory_space<any>>) target(%arg6 : memref<256x128xf32, #tpu.memory_space<vmem>>) target_semaphore(%arg8 : memref<!tpu.dma_semaphore, #tpu.memory_space<semaphore_mem>>)
      tpu.wait_dma2 semaphore(%arg8 : memref<!tpu.dma_semaphore, #tpu.memory_space<semaphore_mem>>) src(%arg2 : memref<256x128xf32, #tpu.memory_space<any>>) dst(%arg6 : memref<256x128xf32, #tpu.memory_space<vmem>>)
    } else {
    }
    %c0_i32_2 = arith.constant 0 : i32
    %5 = arith.cmpi eq, %arg1, %c0_i32_2 : i32
    %6 = arith.extui %5 : i1 to i32
    %c0_i32_3 = arith.constant 0 : i32
    %7 = arith.cmpi ne, %6, %c0_i32_3 : i32
    scf.if %7 {
      %c0_10 = arith.constant 0 : index
      %c0_11 = arith.constant 0 : index
      %14 = vector.load %arg6[%c0_10, %c0_11] : memref<256x128xf32, #tpu.memory_space<vmem>>, vector<256x128xf32>
      %c0_12 = arith.constant 0 : index
      %c0_13 = arith.constant 0 : index
      %15 = vector.load %arg3[%c0_12, %c0_13] : memref<128x128xf32, #tpu.memory_space<vmem>>, vector<128x128xf32>
      %cst_14 = arith.constant dense<0.000000e+00> : vector<256x128xf32>
      %16 = tpu.matmul %14, %15, %cst_14 {dimension_numbers = #tpu.dot_dimension_numbers<[1], [0], [0], [1], [0, 0, 1, 1], [], []>} : vector<256x128xf32>, vector<128x128xf32>, vector<256x128xf32> -> vector<256x128xf32>
      %c0_15 = arith.constant 0 : index
      %c0_16 = arith.constant 0 : index
      %17 = vector.load %arg7[%c0_15, %c0_16] : memref<256x128xf32, #tpu.memory_space<vmem>>, vector<256x128xf32>
      tpu.vector_store %arg7[%c0_15, %c0_16], %16 {strides = array<i32>} : memref<256x128xf32, #tpu.memory_space<vmem>>, vector<256x128xf32>,
    } else {
    }
    %c0 = arith.constant 0 : index
    %c0_4 = arith.constant 0 : index
    %8 = vector.load %arg4[%c0, %c0_4] : memref<256x256xf32, #tpu.memory_space<vmem>>, vector<256x256xf32>
    %c0_5 = arith.constant 0 : index
    %c0_6 = arith.constant 0 : index
    %9 = vector.load %arg7[%c0_5, %c0_6] : memref<256x128xf32, #tpu.memory_space<vmem>>, vector<256x128xf32>
    %cst = arith.constant dense<0.000000e+00> : vector<256x128xf32>
    %10 = tpu.matmul %8, %9, %cst {dimension_numbers = #tpu.dot_dimension_numbers<[1], [0], [0], [1], [0, 0, 1, 1], [], []>} : vector<256x256xf32>, vector<256x128xf32>, vector<256x128xf32> -> vector<256x128xf32>
    %cst_7 = arith.constant 0.000000e+00 : f32
    %11 = vector.broadcast %cst_7 : f32 to vector<256x128xf32>
    %12 = arith.maximumf %10, %11 : vector<256x128xf32>
    %c0_8 = arith.constant 0 : index
    %c0_9 = arith.constant 0 : index
    %13 = vector.load %arg5[%c0_8, %c0_9] : memref<256x128xf32, #tpu.memory_space<vmem>>, vector<256x128xf32>
    tpu.vector_store %arg5[%c0_8, %c0_9], %12 {strides = array<i32>} : memref<256x128xf32, #tpu.memory_space<vmem>>, vector<256x128xf32>,
    return
  }
  func.func @transform_1(%arg0: i32, %arg1: i32) -> (i32, i32) {
    %c0_i32 = arith.constant 0 : i32
    %c0_i32_0 = arith.constant 0 : i32
    return %c0_i32, %arg0 : i32, i32
  }
  func.func @transform_2(%arg0: i32, %arg1: i32) -> (i32, i32) {
    %c0_i32 = arith.constant 0 : i32
    %c0_i32_0 = arith.constant 0 : i32
    return %arg1, %c0_i32 : i32, i32
  }
  func.func @transform_3(%arg0: i32, %arg1: i32) -> (i32, i32) {
    %c0_i32 = arith.constant 0 : i32
    return %arg1, %arg0 : i32, i32
  }
}

module attributes {stable_mosaic.version = 11 : i64} {
  func.func @_fused_gnn_z_kernel(%arg0: i32, %arg1: i32, %arg2: memref<256x128xf32, #tpu.memory_space<any>>, %arg3: memref<128x128xf32, #tpu.memory_space<vmem>>, %arg4: memref<256x256xf32, #tpu.memory_space<vmem>>, %arg5: memref<128x128xf32, #tpu.memory_space<vmem>>, %arg6: memref<1x128xf32, #tpu.memory_space<vmem>>, %arg7: memref<256x128xf32, #tpu.memory_space<vmem>>, %arg8: memref<256x128xf32, #tpu.memory_space<vmem>>, %arg9: memref<256x128xf32, #tpu.memory_space<vmem>>, %arg10: memref<256x128xf32, #tpu.memory_space<vmem>>, %arg11: memref<!tpu.dma_semaphore, #tpu.memory_space<semaphore_mem>>) attributes {dimension_semantics = [#tpu.dimension_semantics<parallel>, #tpu.dimension_semantics<arbitrary>], iteration_bounds = array<i64: 1, 1>, scalar_prefetch = 0 : i64, scratch_operands = 3 : i64, tpu.core_type = #tpu.core_type<tc>, window_params = [{}, {transform_indices = @transform_1, window_bounds = array<i64: 128, 128>}, {transform_indices = @transform_2, window_bounds = array<i64: 256, 256>}, {pipeline_mode = #tpu.pipeline_mode<synchronous>, transform_indices = @transform_3, window_bounds = array<i64: 128, 128>}, {pipeline_mode = #tpu.pipeline_mode<synchronous>, transform_indices = @transform_4, window_bounds = array<i64: 1, 128>}, {transform_indices = @transform_5, window_bounds = array<i64: 256, 128>}, {transform_indices = @transform_6, window_bounds = array<i64: 256, 128>}]} {
    %c0_i32 = arith.constant 0 : i32
    %0 = arith.cmpi eq, %arg1, %c0_i32 : i32
    %1 = arith.extui %0 : i1 to i32
    %c0_i32_0 = arith.constant 0 : i32
    %2 = arith.cmpi ne, %1, %c0_i32_0 : i32
    scf.if %2 {
      tpu.enqueue_dma source(%arg2 : memref<256x128xf32, #tpu.memory_space<any>>) target(%arg9 : memref<256x128xf32, #tpu.memory_space<vmem>>) target_semaphore(%arg11 : memref<!tpu.dma_semaphore, #tpu.memory_space<semaphore_mem>>)
      tpu.wait_dma2 semaphore(%arg11 : memref<!tpu.dma_semaphore, #tpu.memory_space<semaphore_mem>>) src(%arg2 : memref<256x128xf32, #tpu.memory_space<any>>) dst(%arg9 : memref<256x128xf32, #tpu.memory_space<vmem>>)
      %c0_14 = arith.constant 0 : index
      %c0_15 = arith.constant 0 : index
      %15 = vector.load %arg9[%c0_14, %c0_15] : memref<256x128xf32, #tpu.memory_space<vmem>>, vector<256x128xf32>
      %c0_16 = arith.constant 0 : index
      %c0_17 = arith.constant 0 : index
      %16 = vector.load %arg3[%c0_16, %c0_17] : memref<128x128xf32, #tpu.memory_space<vmem>>, vector<128x128xf32>
      %cst_18 = arith.constant dense<0.000000e+00> : vector<256x128xf32>
      %17 = tpu.matmul %15, %16, %cst_18 {dimension_numbers = #tpu.dot_dimension_numbers<[1], [0], [0], [1], [0, 0, 1, 1], [], []>} : vector<256x128xf32>, vector<128x128xf32>, vector<256x128xf32> -> vector<256x128xf32>
      %c0_19 = arith.constant 0 : index
      %c0_20 = arith.constant 0 : index
      %18 = vector.load %arg10[%c0_19, %c0_20] : memref<256x128xf32, #tpu.memory_space<vmem>>, vector<256x128xf32>
      tpu.vector_store %arg10[%c0_19, %c0_20], %17 {strides = array<i32>} : memref<256x128xf32, #tpu.memory_space<vmem>>, vector<256x128xf32>,
    } else {
    }
    %c0 = arith.constant 0 : index
    %c0_1 = arith.constant 0 : index
    %3 = vector.load %arg4[%c0, %c0_1] : memref<256x256xf32, #tpu.memory_space<vmem>>, vector<256x256xf32>
    %c0_2 = arith.constant 0 : index
    %c0_3 = arith.constant 0 : index
    %4 = vector.load %arg10[%c0_2, %c0_3] : memref<256x128xf32, #tpu.memory_space<vmem>>, vector<256x128xf32>
    %cst = arith.constant dense<0.000000e+00> : vector<256x128xf32>
    %5 = tpu.matmul %3, %4, %cst {dimension_numbers = #tpu.dot_dimension_numbers<[1], [0], [0], [1], [0, 0, 1, 1], [], []>} : vector<256x256xf32>, vector<256x128xf32>, vector<256x128xf32> -> vector<256x128xf32>
    %cst_4 = arith.constant 0.000000e+00 : f32
    %6 = vector.broadcast %cst_4 : f32 to vector<256x128xf32>
    %7 = arith.maximumf %5, %6 : vector<256x128xf32>
    %c0_5 = arith.constant 0 : index
    %c0_6 = arith.constant 0 : index
    %8 = vector.load %arg7[%c0_5, %c0_6] : memref<256x128xf32, #tpu.memory_space<vmem>>, vector<256x128xf32>
    tpu.vector_store %arg7[%c0_5, %c0_6], %7 {strides = array<i32>} : memref<256x128xf32, #tpu.memory_space<vmem>>, vector<256x128xf32>,
    %c0_7 = arith.constant 0 : index
    %c0_8 = arith.constant 0 : index
    %9 = vector.load %arg5[%c0_7, %c0_8] : memref<128x128xf32, #tpu.memory_space<vmem>>, vector<128x128xf32>
    %cst_9 = arith.constant dense<0.000000e+00> : vector<256x128xf32>
    %10 = tpu.matmul %7, %9, %cst_9 {dimension_numbers = #tpu.dot_dimension_numbers<[1], [0], [0], [1], [0, 0, 1, 1], [], []>} : vector<256x128xf32>, vector<128x128xf32>, vector<256x128xf32> -> vector<256x128xf32>
    %c0_10 = arith.constant 0 : index
    %c0_11 = arith.constant 0 : index
    %11 = vector.load %arg6[%c0_10, %c0_11] : memref<1x128xf32, #tpu.memory_space<vmem>>, vector<1x128xf32>
    %12 = vector.broadcast %11 : vector<1x128xf32> to vector<256x128xf32>
    %13 = arith.addf %10, %12 : vector<256x128xf32>
    %c0_12 = arith.constant 0 : index
    %c0_13 = arith.constant 0 : index
    %14 = vector.load %arg8[%c0_12, %c0_13] : memref<256x128xf32, #tpu.memory_space<vmem>>, vector<256x128xf32>
    tpu.vector_store %arg8[%c0_12, %c0_13], %13 {strides = array<i32>} : memref<256x128xf32, #tpu.memory_space<vmem>>, vector<256x128xf32>,
    return
  }
  func.func @transform_1(%arg0: i32, %arg1: i32) -> (i32, i32) {
    %c0_i32 = arith.constant 0 : i32
    %c0_i32_0 = arith.constant 0 : i32
    return %c0_i32, %arg0 : i32, i32
  }
  func.func @transform_2(%arg0: i32, %arg1: i32) -> (i32, i32) {
    %c0_i32 = arith.constant 0 : i32
    %c0_i32_0 = arith.constant 0 : i32
    return %arg1, %c0_i32 : i32, i32
  }
  func.func @transform_3(%arg0: i32, %arg1: i32) -> (i32, i32) {
    %c0_i32 = arith.constant 0 : i32
    %c0_i32_0 = arith.constant 0 : i32
    %c0_i32_1 = arith.constant 0 : i32
    return %c0_i32, %c0_i32_0 : i32, i32
  }
  func.func @transform_4(%arg0: i32, %arg1: i32) -> (i32, i32) {
    %c0_i32 = arith.constant 0 : i32
    %c0_i32_0 = arith.constant 0 : i32
    %c0_i32_1 = arith.constant 0 : i32
    return %c0_i32, %c0_i32_0 : i32, i32
  }
  func.func @transform_5(%arg0: i32, %arg1: i32) -> (i32, i32) {
    %c0_i32 = arith.constant 0 : i32
    return %arg1, %arg0 : i32, i32
  }
  func.func @transform_6(%arg0: i32, %arg1: i32) -> (i32, i32) {
    %c0_i32 = arith.constant 0 : i32
    %c0_i32_0 = arith.constant 0 : i32
    return %arg1, %c0_i32 : i32, i32
  }
}

</mosaic_0001>

<bundles_post_ra>
// kernel: gcn_encoder_forward.3
= control target key start
LH: loop header
LB: loop body
LE: loop exit
PB: predicated region body
PF: predicated region fallthrough
CT: control target
= control target key end

     0   :  { %12 = vsyncpa [#allocation6], 0  ;;  %s2213_s0 = inlined_call_operand.vmem [shape: f32[256,128], index: 0, kind: input, shape index: {}]   ;;  %s2214_s1 = inlined_call_operand.vmem [shape: f32[128,128], index: 1, kind: input, shape index: {}]   ;;  %s2215_s2 = inlined_call_operand.vmem [shape: f32[256,256], index: 2, kind: input, shape index: {}]   ;;  %s2216_s3 = inlined_call_operand.vmem [shape: f32[128,128], index: 3, kind: input, shape index: {}]   ;;  %s2217_s4 = inlined_call_operand.vmem [shape: f32[1,128], index: 4, kind: input, shape index: {}]   ;;  %s2218_s5 = inlined_call_operand.hbm [shape: f32[256,128], index: 5, kind: output, shape index: {0}]   ;;  %s2219_s6 = inlined_call_operand.vmem [shape: f32[256,128], index: 6, kind: output, shape index: {1}]  }
   0x1   :  { %v57_v0 = vld [vmem:[%s2213_s0] sm:$0xff]  ;;  %v1581_v1 = vld [vmem:[%s2213_s0 + $0x8] sm:$0xff]  ;;  %v1586_v2 = vld [vmem:[%s2213_s0 + $0x10] sm:$0xff] }
   0x2   :  { %v1591_v3 = vld [vmem:[%s2213_s0 + $0x18] sm:$0xff]  ;;  %v1596_v4 = vld [vmem:[%s2213_s0 + $0x20] sm:$0xff]  ;;  %v1601_v5 = vld [vmem:[%s2213_s0 + $0x28] sm:$0xff] }
   0x3   :  { %v1606_v6 = vld [vmem:[%s2213_s0 + $0x30] sm:$0xff]  ;;  %v1611_v7 = vld [vmem:[%s2213_s0 + $0x38] sm:$0xff]  ;;  %v1616_v8 = vld [vmem:[%s2213_s0 + $0x40] sm:$0xff] }
   0x4   :  { %v1621_v9 = vld [vmem:[%s2213_s0 + $0x48] sm:$0xff]  ;;  %v1626_v10 = vld [vmem:[%s2213_s0 + $0x50] sm:$0xff]  ;;  %v1631_v11 = vld [vmem:[%s2213_s0 + $0x58] sm:$0xff] }
   0x5   :  { %v1636_v12 = vld [vmem:[%s2213_s0 + $0x60] sm:$0xff]  ;;  %v1641_v13 = vld [vmem:[%s2213_s0 + $0x68] sm:$0xff]  ;;  %v1646_v14 = vld [vmem:[%s2213_s0 + $0x70] sm:$0xff] }
   0x6   :  { %v1651_v15 = vld [vmem:[%s2213_s0 + $0x78] sm:$0xff]  ;;  %v1656_v16 = vld [vmem:[%s2213_s0 + $0x80] sm:$0xff]  ;;  %v1661_v17 = vld [vmem:[%s2213_s0 + $0x88] sm:$0xff] }
   0x7   :  { %v1666_v18 = vld [vmem:[%s2213_s0 + $0x90] sm:$0xff]  ;;  %v1671_v19 = vld [vmem:[%s2213_s0 + $0x98] sm:$0xff]  ;;  %v1676_v20 = vld [vmem:[%s2213_s0 + $0xa0] sm:$0xff] }
   0x8   :  { %v1681_v21 = vld [vmem:[%s2213_s0 + $0xa8] sm:$0xff]  ;;  %v1686_v22 = vld [vmem:[%s2213_s0 + $0xb0] sm:$0xff]  ;;  %v1691_v23 = vld [vmem:[%s2213_s0 + $0xb8] sm:$0xff] }
   0x9   :  { %v1696_v24 = vld [vmem:[%s2213_s0 + $0xc0] sm:$0xff]  ;;  %v1701_v25 = vld [vmem:[%s2213_s0 + $0xc8] sm:$0xff]  ;;  %v1706_v26 = vld [vmem:[%s2213_s0 + $0xd0] sm:$0xff] }
   0xa   :  { %v1711_v27 = vld [vmem:[%s2213_s0 + $0xd8] sm:$0xff]  ;;  %v1716_v28 = vld [vmem:[%s2213_s0 + $0xe0] sm:$0xff]  ;;  %v1721_v29 = vld [vmem:[%s2213_s0 + $0xe8] sm:$0xff] }
   0xb   :  { %v1726_v30 = vld [vmem:[%s2213_s0 + $0xf0] sm:$0xff]  ;;  %v1731_v31 = vld [vmem:[%s2213_s0 + $0xf8] sm:$0xff] }
   0xc   :  { %128 = vsyncadd [#allocation4], 4096 }
   0xd   :  { %1532 = dma.done.wait [#allocation4], 4096 }
   0xe   :  { %1533 = vsyncadd [#allocation4], 4294963200  ;;  %1266 = vmatprep.mubr.f32.mxu0 %v57_v0  ;;  %v164_v32 = vld [vmem:[%s2214_s1] sm:$0xff]  ;;  %v165_v33 = vld [vmem:[%s2214_s1 + $0x8] sm:$0xff]  ;;  %v1536_v56 = vmov 0.0|0.0  }
   0xf   :  { %v166_v34 = vld [vmem:[%s2214_s1 + $0x10] sm:$0xff]  ;;  %v1394_v35 = vpack.c.bf16 %v165_v33, %v164_v32  ;;  %v167_v36 = vld [vmem:[%s2214_s1 + $0x18] sm:$0xff]  ;;  %v168_v38 = vld [vmem:[%s2214_s1 + $0x20] sm:$0xff]  ;;  %1426 = vmatprep.subr.bf16.mxu1 %v1536_v56 }
  0x10   :  { %v1398_v37 = vpack.c.bf16 %v167_v36, %v166_v34  ;;  %v169_v39 = vld [vmem:[%s2214_s1 + $0x28] sm:$0xff]  ;;  %v170_v41 = vld [vmem:[%s2214_s1 + $0x30] sm:$0xff]  ;;  %v171_v42 = vld [vmem:[%s2214_s1 + $0x38] sm:$0xff] }
  0x11   :  { %1395 = vmatprep.subr.bf16.mxu0 %v1394_v35  ;;  %v1402_v40 = vpack.c.bf16 %v169_v39, %v168_v38  ;;  %v1406_v43 = vpack.c.bf16 %v171_v42, %v170_v41  ;;  %v172_v44 = vld [vmem:[%s2214_s1 + $0x40] sm:$0xff]  ;;  %v173_v45 = vld [vmem:[%s2214_s1 + $0x48] sm:$0xff]  ;;  %v174_v47 = vld [vmem:[%s2214_s1 + $0x50] sm:$0xff] }
  0x12   :  { %1397 = vmatpush3.bf16.msra.mxu0 %v1394_v35  ;;  %v1410_v46 = vpack.c.bf16 %v173_v45, %v172_v44  ;;  %v175_v48 = vld [vmem:[%s2214_s1 + $0x58] sm:$0xff]  ;;  %v176_v50 = vld [vmem:[%s2214_s1 + $0x60] sm:$0xff]  ;;  %v177_v51 = vld [vmem:[%s2214_s1 + $0x68] sm:$0xff] }
  0x13   :  { %1399 = vmatprep.subr.bf16.mxu0 %v1398_v37  ;;  %v1414_v49 = vpack.c.bf16 %v175_v48, %v174_v47  ;;  %v1418_v52 = vpack.c.bf16 %v177_v51, %v176_v50  ;;  %v178_v53 = vld [vmem:[%s2214_s1 + $0x70] sm:$0xff]  ;;  %v179_v54 = vld [vmem:[%s2214_s1 + $0x78] sm:$0xff]  ;;  %v438_v57 = vld [vmem:[%s2215_s2 + $0x8] sm:$0xff] }
  0x14   :  { %v1422_v55 = vpack.c.bf16 %v179_v54, %v178_v53  ;;  %597 = vmatprep.mubr.f32.mxu1 %v438_v57  ;;  %v822_v42 = vld [vmem:[%s2216_s3] sm:$0xff]  ;;  %v824_v44 = vld [vmem:[%s2216_s3 + $0x10] sm:$0xff]  ;;  %v825_v47 = vld [vmem:[%s2216_s3 + $0x18] sm:$0xff] }
  0x15   :  { %v437_v45 = vld [vmem:[%s2215_s2] sm:$0xff]  ;;  %v440_v48 = vld [vmem:[%s2215_s2 + $0x18] sm:$0xff]  ;;  %v827_v51 = vld [vmem:[%s2216_s3 + $0x28] sm:$0xff] }
  0x16   :  { %1401 = vmatpush3.bf16.msra.mxu0 %v1398_v37  ;;  %v826_v50 = vld [vmem:[%s2216_s3 + $0x20] sm:$0xff]  ;;  %v442_v54 = vld [vmem:[%s2215_s2 + $0x28] sm:$0xff] }
  0x17   :  { %1403 = vmatprep.subr.bf16.mxu0 %v1402_v40  ;;  %v1482_v53 = vpack.c.bf16 %v827_v51, %v826_v50  ;;  %v441_v57 = vld [vmem:[%s2215_s2 + $0x20] sm:$0xff]  ;;  %v488_v51 = vld [vmem:[%s2215_s2 + $0x198] sm:$0xff] }
  0x18   :  { %v485_v50 = vld [vmem:[%s2215_s2 + $0x180] sm:$0xff] }
  0x1a   :  { %1405 = vmatpush3.bf16.msra.mxu0 %v1402_v40 }
  0x1b   :  { %1407 = vmatprep.subr.bf16.mxu0 %v1406_v43 }
  0x1e   :  { %1409 = vmatpush3.bf16.msra.mxu0 %v1406_v43  ;;  %v823_v43 = vld [vmem:[%s2216_s3 + $0x8] sm:$0xff] }
  0x1f   :  { %1411 = vmatprep.subr.bf16.mxu0 %v1410_v46 }
  0x22   :  { %1413 = vmatpush3.bf16.msra.mxu0 %v1410_v46  ;;  %v1474_v46 = vpack.c.bf16 %v823_v43, %v822_v42  ;;  %v482_v42 = vld [vmem:[%s2215_s2 + $0x168] sm:$0xff]  ;;  %v836_v43 = vld [vmem:[%s2216_s3 + $0x70] sm:$0xff] }
  0x23   :  { %1415 = vmatprep.subr.bf16.mxu0 %v1414_v49 }
  0x26   :  { %1417 = vmatpush3.bf16.msra.mxu0 %v1414_v49  ;;  %v1478_v49 = vpack.c.bf16 %v825_v47, %v824_v44  ;;  %v837_v44 = vld [vmem:[%s2216_s3 + $0x78] sm:$0xff] }
  0x27   :  { %1419 = vmatprep.subr.bf16.mxu0 %v1418_v52  ;;  %v484_v47 = vld [vmem:[%s2215_s2 + $0x178] sm:$0xff] }
  0x2a   :  { %1421 = vmatpush3.bf16.msra.mxu0 %v1418_v52  ;;  %v439_v52 = vld [vmem:[%s2215_s2 + $0x10] sm:$0xff] }
  0x2b   :  { %1423 = vmatprep.subr.bf16.mxu0 %v1422_v55 }
  0x2e   :  { %1425 = vmatpush3.bf16.msra.mxu0 %v1422_v55  ;;  %v828_v55 = vld [vmem:[%s2216_s3 + $0x30] sm:$0xff] }
  0x2f   :  { %1475 = vmatprep.subr.bf16.mxu0 %v1474_v46 }
  0x31   :  { %1267 = vmatmul.mubr.f32.vlgmr.msra.gmra.mrb[0].mxu0 %v1581_v1 }
  0x32   :  { %1269 = vmatprep.mubr.f32.mxu0 %v1586_v2  ;;  %1477 = vmatpush3.bf16.msra.mxu0 %v1474_v46  ;;  %v481_v46 = vld [vmem:[%s2215_s2 + $0x160] sm:$0xff] }
  0x33   :  { %1479 = vmatprep.subr.bf16.mxu0 %v1478_v49 }
  0x35   :  { %1270 = vmatmul.mubr.f32.gmra.mrb[2].mxu0 %v1591_v3 }
  0x36   :  { %1272 = vmatprep.mubr.f32.mxu0 %v1596_v4  ;;  %1481 = vmatpush3.bf16.msra.mxu0 %v1478_v49  ;;  %v486_v49 = vld [vmem:[%s2215_s2 + $0x188] sm:$0xff] }
  0x37   :  { %1483 = vmatprep.subr.bf16.mxu0 %v1482_v53 }
  0x39   :  { %1273 = vmatmul.mubr.f32.gmra.mrb[4].mxu0 %v1601_v5 }
  0x3a   :  { %1275 = vmatprep.mubr.f32.mxu0 %v1606_v6  ;;  %1485 = vmatpush3.bf16.msra.mxu0 %v1482_v53  ;;  %v490_v53 = vld [vmem:[%s2215_s2 + $0x1a8] sm:$0xff] }
  0x3d   :  { %1276 = vmatmul.mubr.f32.gmra.mrb[6].mxu0 %v1611_v7 }
  0x3e   :  { %1278 = vmatprep.mubr.f32.mxu0 %v1616_v8 }
  0x41   :  { %1279 = vmatmul.mubr.f32.gmra.mrb[8].mxu0 %v1621_v9 }
  0x42   :  { %1281 = vmatprep.mubr.f32.mxu0 %v1626_v10 }
  0x45   :  { %1282 = vmatmul.mubr.f32.gmra.mrb[10].mxu0 %v1631_v11 }
  0x46   :  { %1284 = vmatprep.mubr.f32.mxu0 %v1636_v12 }
  0x49   :  { %1285 = vmatmul.mubr.f32.gmra.mrb[12].mxu0 %v1641_v13 }
  0x4a   :  { %1287 = vmatprep.mubr.f32.mxu0 %v1646_v14 }
  0x4d   :  { %1288 = vmatmul.mubr.f32.gmra.mrb[14].mxu0 %v1651_v15 }
  0x4e   :  { %1290 = vmatprep.mubr.f32.mxu0 %v1656_v16 }
  0x51   :  { %1291 = vmatmul.mubr.f32.gmra.mrb[16].mxu0 %v1661_v17 }
  0x52   :  { %1293 = vmatprep.mubr.f32.mxu0 %v1666_v18 }
  0x55   :  { %1294 = vmatmul.mubr.f32.gmra.mrb[18].mxu0 %v1671_v19 }
  0x56   :  { %1296 = vmatprep.mubr.f32.mxu0 %v1676_v20 }
  0x59   :  { %1297 = vmatmul.mubr.f32.gmra.mrb[20].mxu0 %v1681_v21 }
  0x5a   :  { %1299 = vmatprep.mubr.f32.mxu0 %v1686_v22 }
  0x5d   :  { %1300 = vmatmul.mubr.f32.gmra.mrb[22].mxu0 %v1691_v23 }
  0x5e   :  { %1302 = vmatprep.mubr.f32.mxu0 %v1696_v24 }
  0x61   :  { %1303 = vmatmul.mubr.f32.gmra.mrb[24].mxu0 %v1701_v25 }
  0x62   :  { %1305 = vmatprep.mubr.f32.mxu0 %v1706_v26 }
  0x65   :  { %1306 = vmatmul.mubr.f32.gmra.mrb[26].mxu0 %v1711_v27 }
  0x66   :  { %1308 = vmatprep.mubr.f32.mxu0 %v1716_v28 }
  0x69   :  { %1309 = vmatmul.mubr.f32.gmra.mrb[28].mxu0 %v1721_v29 }
  0x6a   :  { %1311 = vmatprep.mubr.f32.mxu0 %v1726_v30 }
  0x6d   :  { %1312 = vmatmul.mubr.f32.gmra.mrb[30].mxu0 %v1731_v31 }
 0x104   :  { %v1268_v58 = vpop.f32.mrb[0].mxu0 }
 0x105   :  { %v246_v59 = vpop.f32.mrb[1].mxu0 }
 0x106   :  { %v1427_v60 = vpack.c.bf16 %v1268_v58, %v246_v59  ;;  %v444_v59 = vld [vmem:[%s2215_s2 + $0x38] sm:$0xff] }
 0x108   :  { %v1271_v61 = vpop.f32.mrb[2].mxu0  ;;  %1428 = vmatpush1.bf16.msra.mxu1 %v1427_v60  ;;  %v830_v60 = vld [vmem:[%s2216_s3 + $0x40] sm:$0xff] }
 0x109   :  { %v256_v62 = vpop.f32.mrb[3].mxu0  ;;  %1429 = vmatprep.subr.bf16.mxu1 %v1536_v56 }
 0x10a   :  { %v1430_v63 = vpack.c.bf16 %v1271_v61, %v256_v62  ;;  %v831_v61 = vld [vmem:[%s2216_s3 + $0x48] sm:$0xff]  ;;  %v443_v62 = vld [vmem:[%s2215_s2 + $0x30] sm:$0xff] }
 0x10c   :  { %v1274_v0 = vpop.f32.mrb[4].mxu0  ;;  %1431 = vmatpush1.bf16.msra.mxu1 %v1430_v63  ;;  %v1490_v63 = vpack.c.bf16 %v831_v61, %v830_v60  ;;  %v495_v60 = vld [vmem:[%s2215_s2 + $0x1d0] sm:$0xff]  ;;  %v498_v61 = vld [vmem:[%s2215_s2 + $0x1e8] sm:$0xff] }
 0x10d   :  { %v266_v1 = vpop.f32.mrb[5].mxu0  ;;  %1432 = vmatprep.subr.bf16.mxu1 %v1536_v56 }
 0x10e   :  { %v1433_v2 = vpack.c.bf16 %v1274_v0, %v266_v1  ;;  %v446_v0 = vld [vmem:[%s2215_s2 + $0x48] sm:$0xff]  ;;  %v832_v1 = vld [vmem:[%s2216_s3 + $0x50] sm:$0xff] }
 0x110   :  { %v1277_v3 = vpop.f32.mrb[6].mxu0  ;;  %1434 = vmatpush1.bf16.msra.mxu1 %v1433_v2  ;;  %v833_v2 = vld [vmem:[%s2216_s3 + $0x58] sm:$0xff] }
 0x111   :  { %v276_v4 = vpop.f32.mrb[7].mxu0  ;;  %1435 = vmatprep.subr.bf16.mxu1 %v1536_v56 }
 0x112   :  { %v1436_v5 = vpack.c.bf16 %v1277_v3, %v276_v4  ;;  %v445_v3 = vld [vmem:[%s2215_s2 + $0x40] sm:$0xff]  ;;  %v1494_v4 = vpack.c.bf16 %v833_v2, %v832_v1 }
 0x114   :  { %v1280_v6 = vpop.f32.mrb[8].mxu0  ;;  %1437 = vmatpush1.bf16.msra.mxu1 %v1436_v5  ;;  %v448_v5 = vld [vmem:[%s2215_s2 + $0x58] sm:$0xff] }
 0x115   :  { %v286_v7 = vpop.f32.mrb[9].mxu0  ;;  %1438 = vmatprep.subr.bf16.mxu1 %v1536_v56 }
 0x116   :  { %v1439_v8 = vpack.c.bf16 %v1280_v6, %v286_v7  ;;  %v834_v6 = vld [vmem:[%s2216_s3 + $0x60] sm:$0xff]  ;;  %v835_v7 = vld [vmem:[%s2216_s3 + $0x68] sm:$0xff] }
 0x118   :  { %v1283_v9 = vpop.f32.mrb[10].mxu0  ;;  %1440 = vmatpush1.bf16.msra.mxu1 %v1439_v8  ;;  %v447_v8 = vld [vmem:[%s2215_s2 + $0x50] sm:$0xff] }
 0x119   :  { %v296_v10 = vpop.f32.mrb[11].mxu0  ;;  %1441 = vmatprep.subr.bf16.mxu1 %v1536_v56 }
 0x11a   :  { %v1442_v11 = vpack.c.bf16 %v1283_v9, %v296_v10  ;;  %v1498_v9 = vpack.c.bf16 %v835_v7, %v834_v6  ;;  %v450_v10 = vld [vmem:[%s2215_s2 + $0x68] sm:$0xff] }
 0x11c   :  { %v1286_v12 = vpop.f32.mrb[12].mxu0  ;;  %1443 = vmatpush1.bf16.msra.mxu1 %v1442_v11  ;;  %v449_v11 = vld [vmem:[%s2215_s2 + $0x60] sm:$0xff] }
 0x11d   :  { %v306_v13 = vpop.f32.mrb[13].mxu0  ;;  %1444 = vmatprep.subr.bf16.mxu1 %v1536_v56 }
 0x11e   :  { %v1445_v14 = vpack.c.bf16 %v1286_v12, %v306_v13  ;;  %v452_v12 = vld [vmem:[%s2215_s2 + $0x78] sm:$0xff]  ;;  %v451_v13 = vld [vmem:[%s2215_s2 + $0x70] sm:$0xff] }
 0x120   :  { %v1289_v15 = vpop.f32.mrb[14].mxu0  ;;  %1446 = vmatpush1.bf16.msra.mxu1 %v1445_v14  ;;  %v454_v14 = vld [vmem:[%s2215_s2 + $0x88] sm:$0xff] }
 0x121   :  { %v316_v16 = vpop.f32.mrb[15].mxu0  ;;  %1447 = vmatprep.subr.bf16.mxu1 %v1536_v56 }
 0x122   :  { %v1448_v17 = vpack.c.bf16 %v1289_v15, %v316_v16  ;;  %v453_v15 = vld [vmem:[%s2215_s2 + $0x80] sm:$0xff]  ;;  %v456_v16 = vld [vmem:[%s2215_s2 + $0x98] sm:$0xff] }
 0x124   :  { %v1292_v18 = vpop.f32.mrb[16].mxu0  ;;  %1449 = vmatpush1.bf16.msra.mxu1 %v1448_v17  ;;  %v455_v17 = vld [vmem:[%s2215_s2 + $0x90] sm:$0xff] }
 0x125   :  { %v326_v19 = vpop.f32.mrb[17].mxu0  ;;  %1450 = vmatprep.subr.bf16.mxu1 %v1536_v56 }
 0x126   :  { %v1451_v20 = vpack.c.bf16 %v1292_v18, %v326_v19  ;;  %v458_v18 = vld [vmem:[%s2215_s2 + $0xa8] sm:$0xff]  ;;  %v457_v19 = vld [vmem:[%s2215_s2 + $0xa0] sm:$0xff] }
 0x128   :  { %v1295_v21 = vpop.f32.mrb[18].mxu0  ;;  %1452 = vmatpush1.bf16.msra.mxu1 %v1451_v20  ;;  %v460_v20 = vld [vmem:[%s2215_s2 + $0xb8] sm:$0xff] }
 0x129   :  { %v336_v22 = vpop.f32.mrb[19].mxu0  ;;  %1453 = vmatprep.subr.bf16.mxu1 %v1536_v56 }
 0x12a   :  { %v1454_v23 = vpack.c.bf16 %v1295_v21, %v336_v22  ;;  %v459_v21 = vld [vmem:[%s2215_s2 + $0xb0] sm:$0xff]  ;;  %v462_v22 = vld [vmem:[%s2215_s2 + $0xc8] sm:$0xff] }
 0x12c   :  { %v1298_v24 = vpop.f32.mrb[20].mxu0  ;;  %1455 = vmatpush1.bf16.msra.mxu1 %v1454_v23  ;;  %v461_v23 = vld [vmem:[%s2215_s2 + $0xc0] sm:$0xff] }
 0x12d   :  { %v346_v25 = vpop.f32.mrb[21].mxu0  ;;  %1456 = vmatprep.subr.bf16.mxu1 %v1536_v56 }
 0x12e   :  { %v1457_v26 = vpack.c.bf16 %v1298_v24, %v346_v25  ;;  %v464_v24 = vld [vmem:[%s2215_s2 + $0xd8] sm:$0xff]  ;;  %v463_v25 = vld [vmem:[%s2215_s2 + $0xd0] sm:$0xff] }
 0x130   :  { %v1301_v27 = vpop.f32.mrb[22].mxu0  ;;  %1458 = vmatpush1.bf16.msra.mxu1 %v1457_v26  ;;  %v466_v26 = vld [vmem:[%s2215_s2 + $0xe8] sm:$0xff] }
 0x131   :  { %v356_v28 = vpop.f32.mrb[23].mxu0  ;;  %1459 = vmatprep.subr.bf16.mxu1 %v1536_v56 }
 0x132   :  { %v1460_v29 = vpack.c.bf16 %v1301_v27, %v356_v28  ;;  %v465_v27 = vld [vmem:[%s2215_s2 + $0xe0] sm:$0xff]  ;;  %v468_v28 = vld [vmem:[%s2215_s2 + $0xf8] sm:$0xff] }
 0x134   :  { %v1304_v30 = vpop.f32.mrb[24].mxu0  ;;  %1461 = vmatpush1.bf16.msra.mxu1 %v1460_v29  ;;  %v467_v29 = vld [vmem:[%s2215_s2 + $0xf0] sm:$0xff] }
 0x135   :  { %v366_v31 = vpop.f32.mrb[25].mxu0  ;;  %1462 = vmatprep.subr.bf16.mxu1 %v1536_v56 }
 0x136   :  { %v1463_v32 = vpack.c.bf16 %v1304_v30, %v366_v31  ;;  %v470_v30 = vld [vmem:[%s2215_s2 + $0x108] sm:$0xff]  ;;  %v469_v31 = vld [vmem:[%s2215_s2 + $0x100] sm:$0xff] }
 0x138   :  { %v1307_v33 = vpop.f32.mrb[26].mxu0  ;;  %1464 = vmatpush1.bf16.msra.mxu1 %v1463_v32  ;;  %v472_v32 = vld [vmem:[%s2215_s2 + $0x118] sm:$0xff] }
 0x139   :  { %v376_v34 = vpop.f32.mrb[27].mxu0  ;;  %1465 = vmatprep.subr.bf16.mxu1 %v1536_v56 }
 0x13a   :  { %v1466_v35 = vpack.c.bf16 %v1307_v33, %v376_v34  ;;  %v471_v33 = vld [vmem:[%s2215_s2 + $0x110] sm:$0xff]  ;;  %v474_v34 = vld [vmem:[%s2215_s2 + $0x128] sm:$0xff] }
 0x13c   :  { %v1310_v36 = vpop.f32.mrb[28].mxu0  ;;  %1467 = vmatpush1.bf16.msra.mxu1 %v1466_v35  ;;  %v473_v35 = vld [vmem:[%s2215_s2 + $0x120] sm:$0xff] }
 0x13d   :  { %v386_v37 = vpop.f32.mrb[29].mxu0  ;;  %1468 = vmatprep.subr.bf16.mxu1 %v1536_v56 }
 0x13e   :  { %v1469_v38 = vpack.c.bf16 %v1310_v36, %v386_v37  ;;  %v476_v36 = vld [vmem:[%s2215_s2 + $0x138] sm:$0xff]  ;;  %v475_v37 = vld [vmem:[%s2215_s2 + $0x130] sm:$0xff] }
 0x140   :  { %v1313_v39 = vpop.f32.mrb[30].mxu0  ;;  %1470 = vmatpush1.bf16.msra.mxu1 %v1469_v38  ;;  %v478_v38 = vld [vmem:[%s2215_s2 + $0x148] sm:$0xff] }
 0x141   :  { %v396_v40 = vpop.f32.mrb[31].mxu0  ;;  %1471 = vmatprep.subr.bf16.mxu1 %v1536_v56  ;;  %v829_v56 = vld [vmem:[%s2216_s3 + $0x38] sm:$0xff] }
 0x142   :  { %v1472_v41 = vpack.c.bf16 %v1313_v39, %v396_v40  ;;  %v1486_v58 = vpack.c.bf16 %v829_v56, %v828_v55  ;;  %v477_v39 = vld [vmem:[%s2215_s2 + $0x140] sm:$0xff]  ;;  %v480_v40 = vld [vmem:[%s2215_s2 + $0x158] sm:$0xff]  ;;  %v491_v56 = vld [vmem:[%s2215_s2 + $0x1b0] sm:$0xff] }
 0x143   :  { %v492_v55 = vld [vmem:[%s2215_s2 + $0x1b8] sm:$0xff] }
 0x144   :  { %1473 = vmatpush1.bf16.msra.mxu1 %v1472_v41  ;;  %1487 = vmatprep.subr.bf16.mxu0 %v1486_v58  ;;  %v479_v41 = vld [vmem:[%s2215_s2 + $0x150] sm:$0xff] }
 0x145   :  { %1489 = vmatpush3.bf16.msra.mxu0 %v1486_v58  ;;  %v493_v58 = vld [vmem:[%s2215_s2 + $0x1c0] sm:$0xff] }
 0x146   :  { %1491 = vmatprep.subr.bf16.mxu0 %v1490_v63 }
 0x147   :  { %598 = vmatmul.mubr.f32.vlgmr.msra.gmra.mrb[0].mxu1 %v437_v45  ;;  %v1502_v45 = vpack.c.bf16 %v837_v44, %v836_v43 }
 0x148   :  { %602 = vmatprep.mubr.f32.mxu1 %v440_v48  ;;  %v483_v48 = vld [vmem:[%s2215_s2 + $0x170] sm:$0xff] }
 0x149   :  { %1493 = vmatpush3.bf16.msra.mxu0 %v1490_v63  ;;  %v500_v63 = vld [vmem:[%s2215_s2 + $0x1f8] sm:$0xff] }
 0x14a   :  { %1495 = vmatprep.subr.bf16.mxu0 %v1494_v4 }
 0x14b   :  { %603 = vmatmul.mubr.f32.gmra.mrb[2].mxu1 %v439_v52  ;;  %v487_v52 = vld [vmem:[%s2215_s2 + $0x190] sm:$0xff] }
 0x14c   :  { %607 = vmatprep.mubr.f32.mxu1 %v442_v54  ;;  %v489_v54 = vld [vmem:[%s2215_s2 + $0x1a0] sm:$0xff] }
 0x14d   :  { %1497 = vmatpush3.bf16.msra.mxu0 %v1494_v4 }
 0x14e   :  { %1499 = vmatprep.subr.bf16.mxu0 %v1498_v9 }
 0x14f   :  { %608 = vmatmul.mubr.f32.gmra.mrb[4].mxu1 %v441_v57  ;;  %v494_v57 = vld [vmem:[%s2215_s2 + $0x1c8] sm:$0xff] }
 0x150   :  { %612 = vmatprep.mubr.f32.mxu1 %v444_v59  ;;  %v496_v59 = vld [vmem:[%s2215_s2 + $0x1d8] sm:$0xff] }
 0x151   :  { %1501 = vmatpush3.bf16.msra.mxu0 %v1498_v9 }
 0x152   :  { %1503 = vmatprep.subr.bf16.mxu0 %v1502_v45 }
 0x153   :  { %613 = vmatmul.mubr.f32.gmra.mrb[6].mxu1 %v443_v62  ;;  %v497_v62 = vld [vmem:[%s2215_s2 + $0x1e0] sm:$0xff] }
 0x154   :  { %617 = vmatprep.mubr.f32.mxu1 %v446_v0  ;;  %v499_v0 = vld [vmem:[%s2215_s2 + $0x1f0] sm:$0xff]  ;;  %s1537_s2 = smov [#allocation5]  }
 0x155   :  { %1505 = vmatpush3.bf16.msra.mxu0 %v1502_v45  ;;  %s1107_s20 = sshll.u32 %s1537_s2, 4  ;;  %s1108_s20 = int_to_ptr.vmem [resolvable:$true] %s1107_s20 }
 0x156   :  { %s1510_s21 = scalar_lea.vmem %s1108_s20, 4096  ;;  %p1515_p1 = scmp.lt.s32.totalorder %s1108_s20, %s1108_s20 }
 0x157   :  { %618 = vmatmul.mubr.f32.gmra.mrb[8].mxu1 %v445_v3  ;;  %p1511_p0 = scmp.ne.s32.totalorder %s1108_s20, %s1510_s21  ;;  %p1516_p2 = scmp.lt.s32.totalorder %s1510_s21, %s1510_s21 }
 0x158   :  { %622 = vmatprep.mubr.f32.mxu1 %v448_v5 }
 0x159   :  { %p1517_p3 = por %p1516_p2, %p1515_p1 }
 0x15b   :  { %623 = vmatmul.mubr.f32.gmra.mrb[10].mxu1 %v447_v8  ;;  %p1518_p4 = pnand %p1517_p3, %p1511_p0 }
 0x15c   :  { %627 = vmatprep.mubr.f32.mxu1 %v450_v10 }
 0x15f   :  { %628 = vmatmul.mubr.f32.gmra.mrb[12].mxu1 %v449_v11 }
 0x160   :  { %632 = vmatprep.mubr.f32.mxu1 %v452_v12 }
 0x163   :  { %633 = vmatmul.mubr.f32.gmra.mrb[14].mxu1 %v451_v13 }
 0x164   :  { %637 = vmatprep.mubr.f32.mxu1 %v454_v14 }
 0x167   :  { %638 = vmatmul.mubr.f32.gmra.mrb[16].mxu1 %v453_v15 }
 0x168   :  { %642 = vmatprep.mubr.f32.mxu1 %v456_v16 }
 0x16b   :  { %643 = vmatmul.mubr.f32.gmra.mrb[18].mxu1 %v455_v17 }
 0x16c   :  { %647 = vmatprep.mubr.f32.mxu1 %v458_v18 }
 0x16f   :  { %648 = vmatmul.mubr.f32.gmra.mrb[20].mxu1 %v457_v19 }
 0x170   :  { %652 = vmatprep.mubr.f32.mxu1 %v460_v20 }
 0x173   :  { %653 = vmatmul.mubr.f32.gmra.mrb[22].mxu1 %v459_v21 }
 0x174   :  { %657 = vmatprep.mubr.f32.mxu1 %v462_v22 }
 0x177   :  { %658 = vmatmul.mubr.f32.gmra.mrb[24].mxu1 %v461_v23 }
 0x178   :  { %662 = vmatprep.mubr.f32.mxu1 %v464_v24 }
 0x17b   :  { %663 = vmatmul.mubr.f32.gmra.mrb[26].mxu1 %v463_v25 }
 0x17c   :  { %667 = vmatprep.mubr.f32.mxu1 %v466_v26 }
 0x17f   :  { %668 = vmatmul.mubr.f32.gmra.mrb[28].mxu1 %v465_v27 }
 0x180   :  { %672 = vmatprep.mubr.f32.mxu1 %v468_v28 }
 0x183   :  { %673 = vmatmul.mubr.f32.gmra.mrb[30].mxu1 %v467_v29 }
 0x184   :  { %677 = vmatprep.mubr.f32.mxu1 %v470_v30 }
 0x187   :  { %678 = vmatmul.mubr.f32.gmra.mrb[32].mxu1 %v469_v31 }
 0x188   :  { %682 = vmatprep.mubr.f32.mxu1 %v472_v32 }
 0x18b   :  { %683 = vmatmul.mubr.f32.gmra.mrb[34].mxu1 %v471_v33 }
 0x18c   :  { %687 = vmatprep.mubr.f32.mxu1 %v474_v34 }
 0x18f   :  { %688 = vmatmul.mubr.f32.gmra.mrb[36].mxu1 %v473_v35 }
 0x190   :  { %692 = vmatprep.mubr.f32.mxu1 %v476_v36 }
 0x193   :  { %693 = vmatmul.mubr.f32.gmra.mrb[38].mxu1 %v475_v37 }
 0x194   :  { %697 = vmatprep.mubr.f32.mxu1 %v478_v38 }
 0x197   :  { %698 = vmatmul.mubr.f32.gmra.mrb[40].mxu1 %v477_v39 }
 0x198   :  { %702 = vmatprep.mubr.f32.mxu1 %v480_v40 }
 0x19b   :  { %703 = vmatmul.mubr.f32.gmra.mrb[42].mxu1 %v479_v41 }
 0x19c   :  { %707 = vmatprep.mubr.f32.mxu1 %v482_v42 }
 0x19f   :  { %708 = vmatmul.mubr.f32.gmra.mrb[44].mxu1 %v481_v46 }
 0x1a0   :  { %712 = vmatprep.mubr.f32.mxu1 %v484_v47 }
 0x1a3   :  { %713 = vmatmul.mubr.f32.gmra.mrb[46].mxu1 %v483_v48 }
 0x1a4   :  { %717 = vmatprep.mubr.f32.mxu1 %v486_v49 }
 0x1a7   :  { %718 = vmatmul.mubr.f32.gmra.mrb[48].mxu1 %v485_v50 }
 0x1a8   :  { %722 = vmatprep.mubr.f32.mxu1 %v488_v51 }
 0x1ab   :  { %723 = vmatmul.mubr.f32.gmra.mrb[50].mxu1 %v487_v52 }
 0x1ac   :  { %727 = vmatprep.mubr.f32.mxu1 %v490_v53 }
 0x1af   :  { %728 = vmatmul.mubr.f32.gmra.mrb[52].mxu1 %v489_v54 }
 0x1b0   :  { %732 = vmatprep.mubr.f32.mxu1 %v492_v55 }
 0x1b3   :  { %733 = vmatmul.mubr.f32.gmra.mrb[54].mxu1 %v491_v56 }
 0x1b4   :  { %737 = vmatprep.mubr.f32.mxu1 %v494_v57 }
 0x1b7   :  { %738 = vmatmul.mubr.f32.gmra.mrb[56].mxu1 %v493_v58 }
 0x1b8   :  { %742 = vmatprep.mubr.f32.mxu1 %v496_v59 }
 0x1bb   :  { %743 = vmatmul.mubr.f32.gmra.mrb[58].mxu1 %v495_v60 }
 0x1bc   :  { %747 = vmatprep.mubr.f32.mxu1 %v498_v61 }
 0x1bf   :  { %748 = vmatmul.mubr.f32.gmra.mrb[60].mxu1 %v497_v62 }
 0x1c0   :  { %752 = vmatprep.mubr.f32.mxu1 %v500_v63 }
 0x1c3   :  { %753 = vmatmul.mubr.f32.gmra.mrb[62].mxu1 %v499_v0 }
 0x21a   :  { %v599_v1 = vpop.f32.mrb[0].mxu1 }
 0x21b   :  { %v758_v2 = vmax.f32 %v599_v1, 0.0  ;;  %v601_v3 = vpop.f32.mrb[1].mxu1 }
 0x21d   :  { %790 = vst [vmem:[#allocation5] sm:$0xff] %v758_v2  ;;  %1346 = vmatprep.mubr.f32.mxu0 %v758_v2 }
 0x21e   :  { %v604_v4 = vpop.f32.mrb[2].mxu1 }
 0x21f   :  { %v759_v5 = vmax.f32 %v604_v4, 0.0  ;;  %v606_v6 = vpop.f32.mrb[3].mxu1 }
 0x221   :  { %791 = vst [vmem:[#allocation5 + $0x8] sm:$0xff] %v759_v5  ;;  %1347 = vmatmul.mubr.f32.vlgmr.msra.gmra.mrb[32].mxu0 %v759_v5 }
 0x222   :  { %v609_v7 = vpop.f32.mrb[4].mxu1 }
 0x223   :  { %v760_v8 = vmax.f32 %v609_v7, 0.0  ;;  %v611_v9 = vpop.f32.mrb[5].mxu1 }
 0x225   :  { %792 = vst [vmem:[#allocation5 + $0x10] sm:$0xff] %v760_v8  ;;  %1349 = vmatprep.mubr.f32.mxu0 %v760_v8 }
 0x226   :  { %v614_v10 = vpop.f32.mrb[6].mxu1 }
 0x227   :  { %v761_v11 = vmax.f32 %v614_v10, 0.0  ;;  %v616_v12 = vpop.f32.mrb[7].mxu1 }
 0x229   :  { %793 = vst [vmem:[#allocation5 + $0x18] sm:$0xff] %v761_v11  ;;  %1350 = vmatmul.mubr.f32.gmra.mrb[34].mxu0 %v761_v11 }
 0x22a   :  { %v619_v13 = vpop.f32.mrb[8].mxu1 }
 0x22b   :  { %v762_v14 = vmax.f32 %v619_v13, 0.0  ;;  %v621_v15 = vpop.f32.mrb[9].mxu1 }
 0x22d   :  { %794 = vst [vmem:[#allocation5 + $0x20] sm:$0xff] %v762_v14  ;;  %1352 = vmatprep.mubr.f32.mxu0 %v762_v14 }
 0x22e   :  { %v624_v16 = vpop.f32.mrb[10].mxu1 }
 0x22f   :  { %v763_v17 = vmax.f32 %v624_v16, 0.0  ;;  %v626_v18 = vpop.f32.mrb[11].mxu1 }
 0x231   :  { %795 = vst [vmem:[#allocation5 + $0x28] sm:$0xff] %v763_v17  ;;  %1353 = vmatmul.mubr.f32.gmra.mrb[36].mxu0 %v763_v17 }
 0x232   :  { %v629_v19 = vpop.f32.mrb[12].mxu1 }
 0x233   :  { %v764_v20 = vmax.f32 %v629_v19, 0.0  ;;  %v631_v21 = vpop.f32.mrb[13].mxu1 }
 0x235   :  { %796 = vst [vmem:[#allocation5 + $0x30] sm:$0xff] %v764_v20  ;;  %1355 = vmatprep.mubr.f32.mxu0 %v764_v20 }
 0x236   :  { %v634_v22 = vpop.f32.mrb[14].mxu1 }
 0x237   :  { %v765_v23 = vmax.f32 %v634_v22, 0.0  ;;  %v636_v24 = vpop.f32.mrb[15].mxu1 }
 0x239   :  { %797 = vst [vmem:[#allocation5 + $0x38] sm:$0xff] %v765_v23  ;;  %1356 = vmatmul.mubr.f32.gmra.mrb[38].mxu0 %v765_v23 }
 0x23a   :  { %v639_v25 = vpop.f32.mrb[16].mxu1 }
 0x23b   :  { %v766_v26 = vmax.f32 %v639_v25, 0.0  ;;  %v641_v27 = vpop.f32.mrb[17].mxu1 }
 0x23d   :  { %798 = vst [vmem:[#allocation5 + $0x40] sm:$0xff] %v766_v26  ;;  %1358 = vmatprep.mubr.f32.mxu0 %v766_v26 }
 0x23e   :  { %v644_v28 = vpop.f32.mrb[18].mxu1 }
 0x23f   :  { %v767_v29 = vmax.f32 %v644_v28, 0.0  ;;  %v646_v30 = vpop.f32.mrb[19].mxu1 }
 0x241   :  { %799 = vst [vmem:[#allocation5 + $0x48] sm:$0xff] %v767_v29  ;;  %1359 = vmatmul.mubr.f32.gmra.mrb[40].mxu0 %v767_v29 }
 0x242   :  { %v649_v31 = vpop.f32.mrb[20].mxu1 }
 0x243   :  { %v768_v32 = vmax.f32 %v649_v31, 0.0  ;;  %v651_v33 = vpop.f32.mrb[21].mxu1 }
 0x245   :  { %800 = vst [vmem:[#allocation5 + $0x50] sm:$0xff] %v768_v32  ;;  %1361 = vmatprep.mubr.f32.mxu0 %v768_v32 }
 0x246   :  { %v654_v34 = vpop.f32.mrb[22].mxu1 }
 0x247   :  { %v769_v35 = vmax.f32 %v654_v34, 0.0  ;;  %v656_v36 = vpop.f32.mrb[23].mxu1 }
 0x249   :  { %801 = vst [vmem:[#allocation5 + $0x58] sm:$0xff] %v769_v35  ;;  %1362 = vmatmul.mubr.f32.gmra.mrb[42].mxu0 %v769_v35 }
 0x24a   :  { %v659_v37 = vpop.f32.mrb[24].mxu1 }
 0x24b   :  { %v770_v38 = vmax.f32 %v659_v37, 0.0  ;;  %v661_v39 = vpop.f32.mrb[25].mxu1 }
 0x24d   :  { %802 = vst [vmem:[#allocation5 + $0x60] sm:$0xff] %v770_v38  ;;  %1364 = vmatprep.mubr.f32.mxu0 %v770_v38 }
 0x24e   :  { %v664_v40 = vpop.f32.mrb[26].mxu1 }
 0x24f   :  { %v771_v41 = vmax.f32 %v664_v40, 0.0  ;;  %v666_v42 = vpop.f32.mrb[27].mxu1 }
 0x251   :  { %803 = vst [vmem:[#allocation5 + $0x68] sm:$0xff] %v771_v41  ;;  %1365 = vmatmul.mubr.f32.gmra.mrb[44].mxu0 %v771_v41 }
 0x252   :  { %v669_v43 = vpop.f32.mrb[28].mxu1 }
 0x253   :  { %v772_v44 = vmax.f32 %v669_v43, 0.0  ;;  %v671_v45 = vpop.f32.mrb[29].mxu1 }
 0x255   :  { %804 = vst [vmem:[#allocation5 + $0x70] sm:$0xff] %v772_v44  ;;  %1367 = vmatprep.mubr.f32.mxu0 %v772_v44 }
 0x256   :  { %v674_v46 = vpop.f32.mrb[30].mxu1 }
 0x257   :  { %v773_v47 = vmax.f32 %v674_v46, 0.0  ;;  %v676_v48 = vpop.f32.mrb[31].mxu1 }
 0x259   :  { %805 = vst [vmem:[#allocation5 + $0x78] sm:$0xff] %v773_v47  ;;  %1368 = vmatmul.mubr.f32.gmra.mrb[46].mxu0 %v773_v47 }
 0x25a   :  { %v679_v49 = vpop.f32.mrb[32].mxu1 }
 0x25b   :  { %v774_v50 = vmax.f32 %v679_v49, 0.0  ;;  %v681_v51 = vpop.f32.mrb[33].mxu1 }
 0x25d   :  { %806 = vst [vmem:[#allocation5 + $0x80] sm:$0xff] %v774_v50  ;;  %1370 = vmatprep.mubr.f32.mxu0 %v774_v50 }
 0x25e   :  { %v684_v52 = vpop.f32.mrb[34].mxu1 }
 0x25f   :  { %v775_v53 = vmax.f32 %v684_v52, 0.0  ;;  %v686_v54 = vpop.f32.mrb[35].mxu1 }
 0x261   :  { %807 = vst [vmem:[#allocation5 + $0x88] sm:$0xff] %v775_v53  ;;  %1371 = vmatmul.mubr.f32.gmra.mrb[48].mxu0 %v775_v53 }
 0x262   :  { %v689_v55 = vpop.f32.mrb[36].mxu1 }
 0x263   :  { %v776_v56 = vmax.f32 %v689_v55, 0.0  ;;  %v691_v57 = vpop.f32.mrb[37].mxu1 }
 0x265   :  { %808 = vst [vmem:[#allocation5 + $0x90] sm:$0xff] %v776_v56  ;;  %1373 = vmatprep.mubr.f32.mxu0 %v776_v56 }
 0x266   :  { %v694_v58 = vpop.f32.mrb[38].mxu1 }
 0x267   :  { %v777_v59 = vmax.f32 %v694_v58, 0.0  ;;  %v696_v60 = vpop.f32.mrb[39].mxu1 }
 0x269   :  { %809 = vst [vmem:[#allocation5 + $0x98] sm:$0xff] %v777_v59  ;;  %1374 = vmatmul.mubr.f32.gmra.mrb[50].mxu0 %v777_v59 }
 0x26a   :  { %v699_v61 = vpop.f32.mrb[40].mxu1 }
 0x26b   :  { %v778_v62 = vmax.f32 %v699_v61, 0.0  ;;  %v701_v63 = vpop.f32.mrb[41].mxu1 }
 0x26d   :  { %810 = vst [vmem:[#allocation5 + $0xa0] sm:$0xff] %v778_v62  ;;  %1376 = vmatprep.mubr.f32.mxu0 %v778_v62 }
 0x26e   :  { %v704_v0 = vpop.f32.mrb[42].mxu1 }
 0x26f   :  { %v779_v1 = vmax.f32 %v704_v0, 0.0  ;;  %v706_v2 = vpop.f32.mrb[43].mxu1 }
 0x271   :  { %811 = vst [vmem:[#allocation5 + $0xa8] sm:$0xff] %v779_v1  ;;  %1377 = vmatmul.mubr.f32.gmra.mrb[52].mxu0 %v779_v1 }
 0x272   :  { %v709_v3 = vpop.f32.mrb[44].mxu1 }
 0x273   :  { %v780_v4 = vmax.f32 %v709_v3, 0.0  ;;  %v711_v5 = vpop.f32.mrb[45].mxu1 }
 0x275   :  { %812 = vst [vmem:[#allocation5 + $0xb0] sm:$0xff] %v780_v4  ;;  %1379 = vmatprep.mubr.f32.mxu0 %v780_v4 }
 0x276   :  { %v714_v6 = vpop.f32.mrb[46].mxu1 }
 0x277   :  { %v781_v7 = vmax.f32 %v714_v6, 0.0  ;;  %v716_v8 = vpop.f32.mrb[47].mxu1 }
 0x279   :  { %813 = vst [vmem:[#allocation5 + $0xb8] sm:$0xff] %v781_v7  ;;  %1380 = vmatmul.mubr.f32.gmra.mrb[54].mxu0 %v781_v7 }
 0x27a   :  { %v719_v9 = vpop.f32.mrb[48].mxu1 }
 0x27b   :  { %v782_v10 = vmax.f32 %v719_v9, 0.0  ;;  %v721_v11 = vpop.f32.mrb[49].mxu1 }
 0x27d   :  { %814 = vst [vmem:[#allocation5 + $0xc0] sm:$0xff] %v782_v10  ;;  %1382 = vmatprep.mubr.f32.mxu0 %v782_v10 }
 0x27e   :  { %v724_v12 = vpop.f32.mrb[50].mxu1 }
 0x27f   :  { %v783_v13 = vmax.f32 %v724_v12, 0.0  ;;  %v726_v14 = vpop.f32.mrb[51].mxu1 }
 0x281   :  { %815 = vst [vmem:[#allocation5 + $0xc8] sm:$0xff] %v783_v13  ;;  %1383 = vmatmul.mubr.f32.gmra.mrb[56].mxu0 %v783_v13 }
 0x282   :  { %v729_v15 = vpop.f32.mrb[52].mxu1 }
 0x283   :  { %v784_v16 = vmax.f32 %v729_v15, 0.0  ;;  %v731_v17 = vpop.f32.mrb[53].mxu1 }
 0x285   :  { %816 = vst [vmem:[#allocation5 + $0xd0] sm:$0xff] %v784_v16  ;;  %1385 = vmatprep.mubr.f32.mxu0 %v784_v16 }
 0x286   :  { %v734_v18 = vpop.f32.mrb[54].mxu1 }
 0x287   :  { %v785_v19 = vmax.f32 %v734_v18, 0.0  ;;  %v736_v20 = vpop.f32.mrb[55].mxu1 }
 0x289   :  { %817 = vst [vmem:[#allocation5 + $0xd8] sm:$0xff] %v785_v19  ;;  %1386 = vmatmul.mubr.f32.gmra.mrb[58].mxu0 %v785_v19 }
 0x28a   :  { %v739_v21 = vpop.f32.mrb[56].mxu1 }
 0x28b   :  { %v786_v22 = vmax.f32 %v739_v21, 0.0  ;;  %v741_v23 = vpop.f32.mrb[57].mxu1 }
 0x28d   :  { %818 = vst [vmem:[#allocation5 + $0xe0] sm:$0xff] %v786_v22  ;;  %1388 = vmatprep.mubr.f32.mxu0 %v786_v22 }
 0x28e   :  { %v744_v24 = vpop.f32.mrb[58].mxu1 }
 0x28f   :  { %v787_v25 = vmax.f32 %v744_v24, 0.0  ;;  %v746_v26 = vpop.f32.mrb[59].mxu1 }
 0x291   :  { %819 = vst [vmem:[#allocation5 + $0xe8] sm:$0xff] %v787_v25  ;;  %1389 = vmatmul.mubr.f32.gmra.mrb[60].mxu0 %v787_v25 }
 0x292   :  { %v749_v27 = vpop.f32.mrb[60].mxu1 }
 0x293   :  { %v788_v28 = vmax.f32 %v749_v27, 0.0  ;;  %v751_v29 = vpop.f32.mrb[61].mxu1 }
 0x295   :  { %820 = vst [vmem:[#allocation5 + $0xf0] sm:$0xff] %v788_v28  ;;  %1391 = vmatprep.mubr.f32.mxu0 %v788_v28 }
 0x296   :  { %v754_v30 = vpop.f32.mrb[62].mxu1 }
 0x297   :  { %v789_v31 = vmax.f32 %v754_v30, 0.0  ;;  %v756_v32 = vpop.f32.mrb[63].mxu1 }
 0x299   :  { %821 = vst [vmem:[#allocation5 + $0xf8] sm:$0xff] %v789_v31  ;;  %1392 = vmatmul.mubr.f32.gmra.mrb[62].mxu0 %v789_v31 }
 0x29a   :  { %1521 = shalt.err (!%p1518_p4)
}
 0x29b   :  { %s1522_s24 = scalar_lea.hbm %s2218_s5, 4096 }
 0x29c   :  { %p1523_p5 = scmp.ne.s32.totalorder %s2218_s5, %s1522_s24  ;;  %p1526_p6 = scmp.lt.u32.totalorder %s1522_s24, %s2218_s5 }
 0x29e   :  { %p1528_p7 = pnand %p1526_p6, %p1523_p5 }
 0x2a0   :  { %1531 = shalt.err (!%p1528_p7)
}
 0x2a1   :  { %s1538_s29 = smov 128   ;;  %s1539_s30 = smov 8   ;;  %v2083_v33 = vld [vmem:[%s2217_s4] ss:$0 sm:$0xff] }
 0x2a2   :  { %1113 = dma.vmem_to_hbm [thread:$0]  %s1108_s20, 4096, %s2218_s5, [#allocation6], %s1538_s29, %s1538_s29, %s1539_s30  }
 0x2f4   :  { %v1348_v34 = vpop.f32.mrb[32].mxu0 }
 0x2f5   :  { %v917_v35 = vadd.f32 %v1348_v34, %v2083_v33  ;;  %v911_v36 = vpop.f32.mrb[33].mxu0 }
 0x2f6   :  { %v912_v37 = vadd.f32 %v2083_v33, %v911_v36 }
 0x2f7   :  { %1071 = vst [vmem:[%s2219_s6 + $0x8] sm:$0xff] %v917_v35 }
 0x2f8   :  { %1070 = vst [vmem:[%s2219_s6] sm:$0xff] %v912_v37 }
 0x2fc   :  { %v1351_v38 = vpop.f32.mrb[34].mxu0 }
 0x2fd   :  { %v927_v39 = vadd.f32 %v1351_v38, %v2083_v33  ;;  %v921_v40 = vpop.f32.mrb[35].mxu0 }
 0x2fe   :  { %v922_v41 = vadd.f32 %v2083_v33, %v921_v40 }
 0x2ff   :  { %1073 = vst [vmem:[%s2219_s6 + $0x18] sm:$0xff] %v927_v39 }
 0x300   :  { %1072 = vst [vmem:[%s2219_s6 + $0x10] sm:$0xff] %v922_v41 }
 0x304   :  { %v1354_v42 = vpop.f32.mrb[36].mxu0 }
 0x305   :  { %v937_v43 = vadd.f32 %v1354_v42, %v2083_v33  ;;  %v931_v44 = vpop.f32.mrb[37].mxu0 }
 0x306   :  { %v932_v45 = vadd.f32 %v2083_v33, %v931_v44 }
 0x307   :  { %1075 = vst [vmem:[%s2219_s6 + $0x28] sm:$0xff] %v937_v43 }
 0x308   :  { %1074 = vst [vmem:[%s2219_s6 + $0x20] sm:$0xff] %v932_v45 }
 0x30c   :  { %v1357_v46 = vpop.f32.mrb[38].mxu0 }
 0x30d   :  { %v947_v47 = vadd.f32 %v1357_v46, %v2083_v33  ;;  %v941_v48 = vpop.f32.mrb[39].mxu0 }
 0x30e   :  { %v942_v49 = vadd.f32 %v2083_v33, %v941_v48 }
 0x30f   :  { %1077 = vst [vmem:[%s2219_s6 + $0x38] sm:$0xff] %v947_v47 }
 0x310   :  { %1076 = vst [vmem:[%s2219_s6 + $0x30] sm:$0xff] %v942_v49 }
 0x314   :  { %v1360_v50 = vpop.f32.mrb[40].mxu0 }
 0x315   :  { %v957_v51 = vadd.f32 %v1360_v50, %v2083_v33  ;;  %v951_v52 = vpop.f32.mrb[41].mxu0 }
 0x316   :  { %v952_v53 = vadd.f32 %v2083_v33, %v951_v52 }
 0x317   :  { %1079 = vst [vmem:[%s2219_s6 + $0x48] sm:$0xff] %v957_v51 }
 0x318   :  { %1078 = vst [vmem:[%s2219_s6 + $0x40] sm:$0xff] %v952_v53 }
 0x31c   :  { %v1363_v54 = vpop.f32.mrb[42].mxu0 }
 0x31d   :  { %v967_v55 = vadd.f32 %v1363_v54, %v2083_v33  ;;  %v961_v56 = vpop.f32.mrb[43].mxu0 }
 0x31e   :  { %v962_v57 = vadd.f32 %v2083_v33, %v961_v56 }
 0x31f   :  { %1081 = vst [vmem:[%s2219_s6 + $0x58] sm:$0xff] %v967_v55 }
 0x320   :  { %1080 = vst [vmem:[%s2219_s6 + $0x50] sm:$0xff] %v962_v57 }
 0x324   :  { %v1366_v58 = vpop.f32.mrb[44].mxu0 }
 0x325   :  { %v977_v59 = vadd.f32 %v1366_v58, %v2083_v33  ;;  %v971_v60 = vpop.f32.mrb[45].mxu0 }
 0x326   :  { %v972_v61 = vadd.f32 %v2083_v33, %v971_v60 }
 0x327   :  { %1083 = vst [vmem:[%s2219_s6 + $0x68] sm:$0xff] %v977_v59 }
 0x328   :  { %1082 = vst [vmem:[%s2219_s6 + $0x60] sm:$0xff] %v972_v61 }
 0x32c   :  { %v1369_v62 = vpop.f32.mrb[46].mxu0 }
 0x32d   :  { %v987_v63 = vadd.f32 %v1369_v62, %v2083_v33  ;;  %v981_v0 = vpop.f32.mrb[47].mxu0 }
 0x32e   :  { %v982_v1 = vadd.f32 %v2083_v33, %v981_v0 }
 0x32f   :  { %1085 = vst [vmem:[%s2219_s6 + $0x78] sm:$0xff] %v987_v63 }
 0x330   :  { %1084 = vst [vmem:[%s2219_s6 + $0x70] sm:$0xff] %v982_v1 }
 0x334   :  { %v1372_v2 = vpop.f32.mrb[48].mxu0 }
 0x335   :  { %v997_v3 = vadd.f32 %v1372_v2, %v2083_v33  ;;  %v991_v4 = vpop.f32.mrb[49].mxu0 }
 0x336   :  { %v992_v5 = vadd.f32 %v2083_v33, %v991_v4 }
 0x337   :  { %1087 = vst [vmem:[%s2219_s6 + $0x88] sm:$0xff] %v997_v3 }
 0x338   :  { %1086 = vst [vmem:[%s2219_s6 + $0x80] sm:$0xff] %v992_v5 }
 0x33c   :  { %v1375_v6 = vpop.f32.mrb[50].mxu0 }
 0x33d   :  { %v1007_v7 = vadd.f32 %v1375_v6, %v2083_v33  ;;  %v1001_v8 = vpop.f32.mrb[51].mxu0 }
 0x33e   :  { %v1002_v9 = vadd.f32 %v2083_v33, %v1001_v8 }
 0x33f   :  { %1089 = vst [vmem:[%s2219_s6 + $0x98] sm:$0xff] %v1007_v7 }
 0x340   :  { %1088 = vst [vmem:[%s2219_s6 + $0x90] sm:$0xff] %v1002_v9 }
 0x344   :  { %v1378_v10 = vpop.f32.mrb[52].mxu0 }
 0x345   :  { %v1017_v11 = vadd.f32 %v1378_v10, %v2083_v33  ;;  %v1011_v12 = vpop.f32.mrb[53].mxu0 }
 0x346   :  { %v1012_v13 = vadd.f32 %v2083_v33, %v1011_v12 }
 0x347   :  { %1091 = vst [vmem:[%s2219_s6 + $0xa8] sm:$0xff] %v1017_v11 }
 0x348   :  { %1090 = vst [vmem:[%s2219_s6 + $0xa0] sm:$0xff] %v1012_v13 }
 0x34c   :  { %v1381_v14 = vpop.f32.mrb[54].mxu0 }
 0x34d   :  { %v1027_v15 = vadd.f32 %v1381_v14, %v2083_v33  ;;  %v1021_v16 = vpop.f32.mrb[55].mxu0 }
 0x34e   :  { %v1022_v17 = vadd.f32 %v2083_v33, %v1021_v16 }
 0x34f   :  { %1093 = vst [vmem:[%s2219_s6 + $0xb8] sm:$0xff] %v1027_v15 }
 0x350   :  { %1092 = vst [vmem:[%s2219_s6 + $0xb0] sm:$0xff] %v1022_v17 }
 0x354   :  { %v1384_v18 = vpop.f32.mrb[56].mxu0 }
 0x355   :  { %v1037_v19 = vadd.f32 %v1384_v18, %v2083_v33  ;;  %v1031_v20 = vpop.f32.mrb[57].mxu0 }
 0x356   :  { %v1032_v21 = vadd.f32 %v2083_v33, %v1031_v20 }
 0x357   :  { %1095 = vst [vmem:[%s2219_s6 + $0xc8] sm:$0xff] %v1037_v19 }
 0x358   :  { %1094 = vst [vmem:[%s2219_s6 + $0xc0] sm:$0xff] %v1032_v21 }
 0x35c   :  { %v1387_v22 = vpop.f32.mrb[58].mxu0 }
 0x35d   :  { %v1047_v23 = vadd.f32 %v1387_v22, %v2083_v33  ;;  %v1041_v24 = vpop.f32.mrb[59].mxu0 }
 0x35e   :  { %v1042_v25 = vadd.f32 %v2083_v33, %v1041_v24 }
 0x35f   :  { %1097 = vst [vmem:[%s2219_s6 + $0xd8] sm:$0xff] %v1047_v23 }
 0x360   :  { %1096 = vst [vmem:[%s2219_s6 + $0xd0] sm:$0xff] %v1042_v25 }
 0x364   :  { %v1390_v26 = vpop.f32.mrb[60].mxu0 }
 0x365   :  { %v1057_v27 = vadd.f32 %v1390_v26, %v2083_v33  ;;  %v1051_v28 = vpop.f32.mrb[61].mxu0 }
 0x366   :  { %v1052_v29 = vadd.f32 %v2083_v33, %v1051_v28 }
 0x367   :  { %1099 = vst [vmem:[%s2219_s6 + $0xe8] sm:$0xff] %v1057_v27 }
 0x368   :  { %1098 = vst [vmem:[%s2219_s6 + $0xe0] sm:$0xff] %v1052_v29 }
 0x36c   :  { %v1393_v30 = vpop.f32.mrb[62].mxu0 }
 0x36d   :  { %v1067_v31 = vadd.f32 %v1393_v30, %v2083_v33  ;;  %v1061_v32 = vpop.f32.mrb[63].mxu0 }
 0x36e   :  { %v1062_v34 = vadd.f32 %v2083_v33, %v1061_v32 }
 0x36f   :  { %1101 = vst [vmem:[%s2219_s6 + $0xf8] sm:$0xff] %v1067_v31 }
 0x370   :  { %1100 = vst [vmem:[%s2219_s6 + $0xf0] sm:$0xff] %v1062_v34 }
 0x371   :  { %1534 = dma.done.wait [#allocation6], 4096  }
 0x372   :  { %1535 = vsyncadd [#allocation6], 4294963200 }
 0x373   :  { %1121 = vsyncpa [#allocation6], 1 }
 0x374   :  { %1122 = vsyncmov [#allocation4] }
 0x377   :  { %s1123_s4 = vpop.sfrf %1122 }
 0x378   :  { %p1137_p8 = scmp.ne.s32.totalorder %s1123_s4, 0 }
 0x37a   :  { %1127 = shalt.err (%p1137_p8)  }

// kernel: gcn_encoder_forward.2
= control target key start
LH: loop header
LB: loop body
LE: loop exit
PB: predicated region body
PF: predicated region fallthrough
CT: control target
= control target key end

     0   :  { %8 = vsyncpa [#allocation6], 0  ;;  %s1122_s12 = smov [#allocation5]   ;;  %s1523_s0 = inlined_call_operand.vmem [shape: f32[256,128], index: 0, kind: input, shape index: {}]   ;;  %s1524_s1 = inlined_call_operand.vmem [shape: f32[128,128], index: 1, kind: input, shape index: {}]   ;;  %s1525_s2 = inlined_call_operand.hbm [shape: f32[256,256], index: 2, kind: input, shape index: {}]   ;;  %s1526_s3 = inlined_call_operand.vmem [shape: f32[256,128], index: 3, kind: output, shape index: {}]  }
   0x1   :  { %s16_s13 = sshll.u32 %s1122_s12, 4  ;;  %s1096_s16 = scalar_lea.hbm %s1525_s2, 8192  ;;  %s17_s13 = int_to_ptr.vmem [resolvable:$true] %s16_s13 }
   0x2   :  { %p1097_p0 = scmp.ne.s32.totalorder %s1525_s2, %s1096_s16  ;;  %p1100_p1 = scmp.lt.u32.totalorder %s1096_s16, %s1525_s2 }
   0x4   :  { %p1102_p2 = pnand %p1100_p1, %p1097_p0 }
   0x6   :  { %1105 = shalt.err (!%p1102_p2)
}
   0x7   :  { %s1106_s21 = scalar_lea.vmem %s17_s13, 8192  ;;  %p1111_p4 = scmp.lt.s32.totalorder %s17_s13, %s17_s13 }
   0x8   :  { %p1107_p3 = scmp.ne.s32.totalorder %s17_s13, %s1106_s21  ;;  %p1112_p5 = scmp.lt.s32.totalorder %s1106_s21, %s1106_s21 }
   0xa   :  { %p1113_p6 = por %p1112_p5, %p1111_p4 }
   0xc   :  { %p1114_p7 = pnand %p1113_p6, %p1107_p3 }
   0xe   :  { %1117 = shalt.err (!%p1114_p7)
}
   0xf   :  { %s1123_s22 = smov 256   ;;  %s1124_s23 = smov 16  }
  0x10   :  { %22 = dma.hbm_to_vmem [thread:$0]  %s1525_s2, 8192, %s17_s13, [#allocation6], %s1123_s22, %s1123_s22, %s1124_s23  }
  0x11   :  { %1118 = dma.done.wait [#allocation6], 8192  }
  0x12   :  { %1119 = vsyncadd [#allocation6], 4294959104  ;;  %v64_v0 = vld [vmem:[%s1523_s0] sm:$0xff]  ;;  %v1164_v1 = vld [vmem:[%s1523_s0 + $0x8] sm:$0xff] }
  0x13   :  { %v1169_v2 = vld [vmem:[%s1523_s0 + $0x10] sm:$0xff]  ;;  %v1174_v3 = vld [vmem:[%s1523_s0 + $0x18] sm:$0xff]  ;;  %v1179_v4 = vld [vmem:[%s1523_s0 + $0x20] sm:$0xff] }
  0x14   :  { %v1184_v5 = vld [vmem:[%s1523_s0 + $0x28] sm:$0xff]  ;;  %v1189_v6 = vld [vmem:[%s1523_s0 + $0x30] sm:$0xff]  ;;  %v1194_v7 = vld [vmem:[%s1523_s0 + $0x38] sm:$0xff] }
  0x15   :  { %v1199_v8 = vld [vmem:[%s1523_s0 + $0x40] sm:$0xff]  ;;  %v1204_v9 = vld [vmem:[%s1523_s0 + $0x48] sm:$0xff]  ;;  %v1209_v10 = vld [vmem:[%s1523_s0 + $0x50] sm:$0xff] }
  0x16   :  { %v1214_v11 = vld [vmem:[%s1523_s0 + $0x58] sm:$0xff]  ;;  %v1219_v12 = vld [vmem:[%s1523_s0 + $0x60] sm:$0xff]  ;;  %v1224_v13 = vld [vmem:[%s1523_s0 + $0x68] sm:$0xff] }
  0x17   :  { %v1229_v14 = vld [vmem:[%s1523_s0 + $0x70] sm:$0xff]  ;;  %v1234_v15 = vld [vmem:[%s1523_s0 + $0x78] sm:$0xff]  ;;  %v1239_v16 = vld [vmem:[%s1523_s0 + $0x80] sm:$0xff] }
  0x18   :  { %v1244_v17 = vld [vmem:[%s1523_s0 + $0x88] sm:$0xff]  ;;  %v1249_v18 = vld [vmem:[%s1523_s0 + $0x90] sm:$0xff]  ;;  %v1254_v19 = vld [vmem:[%s1523_s0 + $0x98] sm:$0xff] }
  0x19   :  { %v1259_v20 = vld [vmem:[%s1523_s0 + $0xa0] sm:$0xff]  ;;  %v1264_v21 = vld [vmem:[%s1523_s0 + $0xa8] sm:$0xff]  ;;  %v1269_v22 = vld [vmem:[%s1523_s0 + $0xb0] sm:$0xff] }
  0x1a   :  { %v1274_v23 = vld [vmem:[%s1523_s0 + $0xb8] sm:$0xff]  ;;  %v1279_v24 = vld [vmem:[%s1523_s0 + $0xc0] sm:$0xff]  ;;  %v1284_v25 = vld [vmem:[%s1523_s0 + $0xc8] sm:$0xff] }
  0x1b   :  { %v1289_v26 = vld [vmem:[%s1523_s0 + $0xd0] sm:$0xff]  ;;  %v1294_v27 = vld [vmem:[%s1523_s0 + $0xd8] sm:$0xff]  ;;  %v1299_v28 = vld [vmem:[%s1523_s0 + $0xe0] sm:$0xff] }
  0x1c   :  { %v1304_v29 = vld [vmem:[%s1523_s0 + $0xe8] sm:$0xff]  ;;  %v1309_v30 = vld [vmem:[%s1523_s0 + $0xf0] sm:$0xff]  ;;  %v1314_v31 = vld [vmem:[%s1523_s0 + $0xf8] sm:$0xff] }
  0x1d   :  { %135 = vsyncadd [#allocation4], 4096 }
  0x1e   :  { %1120 = dma.done.wait [#allocation4], 4096 }
  0x1f   :  { %1121 = vsyncadd [#allocation4], 4294963200  ;;  %932 = vmatprep.mubr.f32.mxu0 %v64_v0  ;;  %v174_v32 = vld [vmem:[%s1524_s1] sm:$0xff]  ;;  %v175_v33 = vld [vmem:[%s1524_s1 + $0x8] sm:$0xff]  ;;  %v1125_v56 = vmov 0.0|0.0  }
  0x20   :  { %v176_v34 = vld [vmem:[%s1524_s1 + $0x10] sm:$0xff]  ;;  %v980_v35 = vpack.c.bf16 %v175_v33, %v174_v32  ;;  %v177_v36 = vld [vmem:[%s1524_s1 + $0x18] sm:$0xff]  ;;  %v178_v38 = vld [vmem:[%s1524_s1 + $0x20] sm:$0xff]  ;;  %1060 = vmatprep.subr.bf16.mxu1 %v1125_v56 }
  0x21   :  { %v984_v37 = vpack.c.bf16 %v177_v36, %v176_v34  ;;  %v179_v39 = vld [vmem:[%s1524_s1 + $0x28] sm:$0xff]  ;;  %v180_v41 = vld [vmem:[%s1524_s1 + $0x30] sm:$0xff]  ;;  %v181_v42 = vld [vmem:[%s1524_s1 + $0x38] sm:$0xff] }
  0x22   :  { %981 = vmatprep.subr.bf16.mxu0 %v980_v35  ;;  %v988_v40 = vpack.c.bf16 %v179_v39, %v178_v38  ;;  %v992_v43 = vpack.c.bf16 %v181_v42, %v180_v41  ;;  %v182_v44 = vld [vmem:[%s1524_s1 + $0x40] sm:$0xff]  ;;  %v183_v45 = vld [vmem:[%s1524_s1 + $0x48] sm:$0xff]  ;;  %v184_v47 = vld [vmem:[%s1524_s1 + $0x50] sm:$0xff] }
  0x23   :  { %983 = vmatpush3.bf16.msra.mxu0 %v980_v35  ;;  %v996_v46 = vpack.c.bf16 %v183_v45, %v182_v44  ;;  %v185_v48 = vld [vmem:[%s1524_s1 + $0x58] sm:$0xff]  ;;  %v186_v50 = vld [vmem:[%s1524_s1 + $0x60] sm:$0xff]  ;;  %v187_v51 = vld [vmem:[%s1524_s1 + $0x68] sm:$0xff] }
  0x24   :  { %985 = vmatprep.subr.bf16.mxu0 %v984_v37  ;;  %v1000_v49 = vpack.c.bf16 %v185_v48, %v184_v47  ;;  %v1004_v52 = vpack.c.bf16 %v187_v51, %v186_v50  ;;  %v188_v53 = vld [vmem:[%s1524_s1 + $0x70] sm:$0xff]  ;;  %v189_v54 = vld [vmem:[%s1524_s1 + $0x78] sm:$0xff]  ;;  %v472_v57 = vld [vmem:[#allocation5 + $0xc8] sm:$0xff] }
  0x25   :  { %v1008_v55 = vpack.c.bf16 %v189_v54, %v188_v53  ;;  %667 = vmatprep.mubr.f32.mxu1 %v472_v57  ;;  %v448_v58 = vld [vmem:[#allocation5 + $0x8] sm:$0xff]  ;;  %v447_v44 = vld [vmem:[#allocation5] sm:$0xff]  ;;  %v474_v45 = vld [vmem:[#allocation5 + $0xd8] sm:$0xff] }
  0x26   :  { %v473_v47 = vld [vmem:[#allocation5 + $0xd0] sm:$0xff]  ;;  %v452_v50 = vld [vmem:[#allocation5 + $0x28] sm:$0xff]  ;;  %v475_v51 = vld [vmem:[#allocation5 + $0xe0] sm:$0xff] }
  0x27   :  { %987 = vmatpush3.bf16.msra.mxu0 %v984_v37  ;;  %v449_v48 = vld [vmem:[#allocation5 + $0x10] sm:$0xff]  ;;  %v478_v53 = vld [vmem:[#allocation5 + $0xf8] sm:$0xff]  ;;  %v480_v57 = vld [vmem:[#allocation5 + $0x108] sm:$0xff] }
  0x28   :  { %989 = vmatprep.subr.bf16.mxu0 %v988_v40  ;;  %v454_v54 = vld [vmem:[#allocation5 + $0x38] sm:$0xff] }
  0x2b   :  { %991 = vmatpush3.bf16.msra.mxu0 %v988_v40 }
  0x2c   :  { %993 = vmatprep.subr.bf16.mxu0 %v992_v43 }
  0x2f   :  { %995 = vmatpush3.bf16.msra.mxu0 %v992_v43  ;;  %v471_v43 = vld [vmem:[#allocation5 + $0xc0] sm:$0xff] }
  0x30   :  { %997 = vmatprep.subr.bf16.mxu0 %v996_v46 }
  0x33   :  { %999 = vmatpush3.bf16.msra.mxu0 %v996_v46  ;;  %v450_v46 = vld [vmem:[#allocation5 + $0x18] sm:$0xff] }
  0x34   :  { %1001 = vmatprep.subr.bf16.mxu0 %v1000_v49 }
  0x37   :  { %1003 = vmatpush3.bf16.msra.mxu0 %v1000_v49  ;;  %v476_v49 = vld [vmem:[#allocation5 + $0xe8] sm:$0xff] }
  0x38   :  { %1005 = vmatprep.subr.bf16.mxu0 %v1004_v52 }
  0x3b   :  { %1007 = vmatpush3.bf16.msra.mxu0 %v1004_v52  ;;  %v451_v52 = vld [vmem:[#allocation5 + $0x20] sm:$0xff] }
  0x3c   :  { %1009 = vmatprep.subr.bf16.mxu0 %v1008_v55 }
  0x3f   :  { %1011 = vmatpush3.bf16.msra.mxu0 %v1008_v55  ;;  %v477_v55 = vld [vmem:[#allocation5 + $0xf0] sm:$0xff] }
  0x40   :  { %1012 = vmatprep.subr.bf16.mxu0 %v1125_v56 }
  0x42   :  { %933 = vmatmul.mubr.f32.vlgmr.msra.gmra.mrb[0].mxu0 %v1164_v1 }
  0x43   :  { %935 = vmatprep.mubr.f32.mxu0 %v1169_v2 }
  0x46   :  { %936 = vmatmul.mubr.f32.gmra.mrb[2].mxu0 %v1174_v3 }
  0x47   :  { %938 = vmatprep.mubr.f32.mxu0 %v1179_v4 }
  0x4a   :  { %939 = vmatmul.mubr.f32.gmra.mrb[4].mxu0 %v1184_v5 }
  0x4b   :  { %941 = vmatprep.mubr.f32.mxu0 %v1189_v6 }
  0x4e   :  { %942 = vmatmul.mubr.f32.gmra.mrb[6].mxu0 %v1194_v7 }
  0x4f   :  { %944 = vmatprep.mubr.f32.mxu0 %v1199_v8 }
  0x52   :  { %945 = vmatmul.mubr.f32.gmra.mrb[8].mxu0 %v1204_v9 }
  0x53   :  { %947 = vmatprep.mubr.f32.mxu0 %v1209_v10 }
  0x56   :  { %948 = vmatmul.mubr.f32.gmra.mrb[10].mxu0 %v1214_v11 }
  0x57   :  { %950 = vmatprep.mubr.f32.mxu0 %v1219_v12 }
  0x5a   :  { %951 = vmatmul.mubr.f32.gmra.mrb[12].mxu0 %v1224_v13 }
  0x5b   :  { %953 = vmatprep.mubr.f32.mxu0 %v1229_v14 }
  0x5e   :  { %954 = vmatmul.mubr.f32.gmra.mrb[14].mxu0 %v1234_v15 }
  0x5f   :  { %956 = vmatprep.mubr.f32.mxu0 %v1239_v16 }
  0x62   :  { %957 = vmatmul.mubr.f32.gmra.mrb[16].mxu0 %v1244_v17 }
  0x63   :  { %959 = vmatprep.mubr.f32.mxu0 %v1249_v18 }
  0x66   :  { %960 = vmatmul.mubr.f32.gmra.mrb[18].mxu0 %v1254_v19 }
  0x67   :  { %962 = vmatprep.mubr.f32.mxu0 %v1259_v20 }
  0x6a   :  { %963 = vmatmul.mubr.f32.gmra.mrb[20].mxu0 %v1264_v21 }
  0x6b   :  { %965 = vmatprep.mubr.f32.mxu0 %v1269_v22 }
  0x6e   :  { %966 = vmatmul.mubr.f32.gmra.mrb[22].mxu0 %v1274_v23 }
  0x6f   :  { %968 = vmatprep.mubr.f32.mxu0 %v1279_v24 }
  0x72   :  { %969 = vmatmul.mubr.f32.gmra.mrb[24].mxu0 %v1284_v25 }
  0x73   :  { %971 = vmatprep.mubr.f32.mxu0 %v1289_v26 }
  0x76   :  { %972 = vmatmul.mubr.f32.gmra.mrb[26].mxu0 %v1294_v27 }
  0x77   :  { %974 = vmatprep.mubr.f32.mxu0 %v1299_v28 }
  0x7a   :  { %975 = vmatmul.mubr.f32.gmra.mrb[28].mxu0 %v1304_v29 }
  0x7b   :  { %977 = vmatprep.mubr.f32.mxu0 %v1309_v30 }
  0x7e   :  { %978 = vmatmul.mubr.f32.gmra.mrb[30].mxu0 %v1314_v31 }
  0x7f   :  { %607 = vmatprep.mubr.f32.mxu0 %v448_v58  ;;  %v456_v58 = vld [vmem:[#allocation5 + $0x48] sm:$0xff] }
 0x115   :  { %v934_v59 = vpop.f32.mrb[0].mxu0 }
 0x116   :  { %v256_v60 = vpop.f32.mrb[1].mxu0 }
 0x117   :  { %v1013_v61 = vpack.c.bf16 %v934_v59, %v256_v60  ;;  %v479_v59 = vld [vmem:[#allocation5 + $0x100] sm:$0xff] }
 0x118   :  { %v455_v60 = vld [vmem:[#allocation5 + $0x40] sm:$0xff] }
 0x119   :  { %v937_v62 = vpop.f32.mrb[2].mxu0  ;;  %1014 = vmatpush1.bf16.msra.mxu0 %v1013_v61  ;;  %1076 = vmatpush1.bf16.msra.mxu1 %v1013_v61  ;;  %v482_v61 = vld [vmem:[#allocation5 + $0x118] sm:$0xff] }
 0x11a   :  { %v266_v63 = vpop.f32.mrb[3].mxu0  ;;  %1015 = vmatprep.subr.bf16.mxu0 %v1125_v56  ;;  %1061 = vmatprep.subr.bf16.mxu1 %v1125_v56 }
 0x11b   :  { %v1016_v0 = vpack.c.bf16 %v937_v62, %v266_v63  ;;  %v458_v62 = vld [vmem:[#allocation5 + $0x58] sm:$0xff]  ;;  %v481_v63 = vld [vmem:[#allocation5 + $0x110] sm:$0xff] }
 0x11d   :  { %v940_v1 = vpop.f32.mrb[4].mxu0  ;;  %1017 = vmatpush1.bf16.msra.mxu0 %v1016_v0  ;;  %1077 = vmatpush1.bf16.msra.mxu1 %v1016_v0  ;;  %v457_v0 = vld [vmem:[#allocation5 + $0x50] sm:$0xff] }
 0x11e   :  { %v276_v2 = vpop.f32.mrb[5].mxu0  ;;  %1018 = vmatprep.subr.bf16.mxu0 %v1125_v56  ;;  %1062 = vmatprep.subr.bf16.mxu1 %v1125_v56 }
 0x11f   :  { %v1019_v3 = vpack.c.bf16 %v940_v1, %v276_v2  ;;  %v484_v1 = vld [vmem:[#allocation5 + $0x128] sm:$0xff] }
 0x120   :  { %v460_v2 = vld [vmem:[#allocation5 + $0x68] sm:$0xff] }
 0x121   :  { %v943_v4 = vpop.f32.mrb[6].mxu0  ;;  %1020 = vmatpush1.bf16.msra.mxu0 %v1019_v3  ;;  %1078 = vmatpush1.bf16.msra.mxu1 %v1019_v3  ;;  %v483_v3 = vld [vmem:[#allocation5 + $0x120] sm:$0xff] }
 0x122   :  { %v286_v5 = vpop.f32.mrb[7].mxu0  ;;  %1021 = vmatprep.subr.bf16.mxu0 %v1125_v56  ;;  %1063 = vmatprep.subr.bf16.mxu1 %v1125_v56 }
 0x123   :  { %v1022_v6 = vpack.c.bf16 %v943_v4, %v286_v5  ;;  %v459_v4 = vld [vmem:[#allocation5 + $0x60] sm:$0xff]  ;;  %v486_v5 = vld [vmem:[#allocation5 + $0x138] sm:$0xff] }
 0x125   :  { %v946_v7 = vpop.f32.mrb[8].mxu0  ;;  %1023 = vmatpush1.bf16.msra.mxu0 %v1022_v6  ;;  %1079 = vmatpush1.bf16.msra.mxu1 %v1022_v6  ;;  %v462_v6 = vld [vmem:[#allocation5 + $0x78] sm:$0xff] }
 0x126   :  { %v296_v8 = vpop.f32.mrb[9].mxu0  ;;  %1024 = vmatprep.subr.bf16.mxu0 %v1125_v56  ;;  %1064 = vmatprep.subr.bf16.mxu1 %v1125_v56 }
 0x127   :  { %v1025_v9 = vpack.c.bf16 %v946_v7, %v296_v8  ;;  %v485_v7 = vld [vmem:[#allocation5 + $0x130] sm:$0xff] }
 0x128   :  { %v461_v8 = vld [vmem:[#allocation5 + $0x70] sm:$0xff] }
 0x129   :  { %v949_v10 = vpop.f32.mrb[10].mxu0  ;;  %1026 = vmatpush1.bf16.msra.mxu0 %v1025_v9  ;;  %1080 = vmatpush1.bf16.msra.mxu1 %v1025_v9  ;;  %v488_v9 = vld [vmem:[#allocation5 + $0x148] sm:$0xff] }
 0x12a   :  { %v306_v11 = vpop.f32.mrb[11].mxu0  ;;  %1027 = vmatprep.subr.bf16.mxu0 %v1125_v56  ;;  %1065 = vmatprep.subr.bf16.mxu1 %v1125_v56 }
 0x12b   :  { %v1028_v12 = vpack.c.bf16 %v949_v10, %v306_v11  ;;  %v464_v10 = vld [vmem:[#allocation5 + $0x88] sm:$0xff]  ;;  %v487_v11 = vld [vmem:[#allocation5 + $0x140] sm:$0xff] }
 0x12d   :  { %v952_v13 = vpop.f32.mrb[12].mxu0  ;;  %1029 = vmatpush1.bf16.msra.mxu0 %v1028_v12  ;;  %1081 = vmatpush1.bf16.msra.mxu1 %v1028_v12  ;;  %v463_v12 = vld [vmem:[#allocation5 + $0x80] sm:$0xff] }
 0x12e   :  { %v316_v14 = vpop.f32.mrb[13].mxu0  ;;  %1030 = vmatprep.subr.bf16.mxu0 %v1125_v56  ;;  %1066 = vmatprep.subr.bf16.mxu1 %v1125_v56 }
 0x12f   :  { %v1031_v15 = vpack.c.bf16 %v952_v13, %v316_v14  ;;  %v490_v13 = vld [vmem:[#allocation5 + $0x158] sm:$0xff] }
 0x130   :  { %v466_v14 = vld [vmem:[#allocation5 + $0x98] sm:$0xff] }
 0x131   :  { %v955_v16 = vpop.f32.mrb[14].mxu0  ;;  %1032 = vmatpush1.bf16.msra.mxu0 %v1031_v15  ;;  %1082 = vmatpush1.bf16.msra.mxu1 %v1031_v15  ;;  %v489_v15 = vld [vmem:[#allocation5 + $0x150] sm:$0xff] }
 0x132   :  { %v326_v17 = vpop.f32.mrb[15].mxu0  ;;  %1033 = vmatprep.subr.bf16.mxu0 %v1125_v56  ;;  %1067 = vmatprep.subr.bf16.mxu1 %v1125_v56 }
 0x133   :  { %v1034_v18 = vpack.c.bf16 %v955_v16, %v326_v17  ;;  %v465_v16 = vld [vmem:[#allocation5 + $0x90] sm:$0xff]  ;;  %v492_v17 = vld [vmem:[#allocation5 + $0x168] sm:$0xff] }
 0x135   :  { %v958_v19 = vpop.f32.mrb[16].mxu0  ;;  %1035 = vmatpush1.bf16.msra.mxu0 %v1034_v18  ;;  %1083 = vmatpush1.bf16.msra.mxu1 %v1034_v18  ;;  %v468_v18 = vld [vmem:[#allocation5 + $0xa8] sm:$0xff] }
 0x136   :  { %v336_v20 = vpop.f32.mrb[17].mxu0  ;;  %1036 = vmatprep.subr.bf16.mxu0 %v1125_v56  ;;  %1068 = vmatprep.subr.bf16.mxu1 %v1125_v56 }
 0x137   :  { %v1037_v21 = vpack.c.bf16 %v958_v19, %v336_v20  ;;  %v491_v19 = vld [vmem:[#allocation5 + $0x160] sm:$0xff] }
 0x138   :  { %v467_v20 = vld [vmem:[#allocation5 + $0xa0] sm:$0xff] }
 0x139   :  { %v961_v22 = vpop.f32.mrb[18].mxu0  ;;  %1038 = vmatpush1.bf16.msra.mxu0 %v1037_v21  ;;  %1084 = vmatpush1.bf16.msra.mxu1 %v1037_v21  ;;  %v494_v21 = vld [vmem:[#allocation5 + $0x178] sm:$0xff] }
 0x13a   :  { %v346_v23 = vpop.f32.mrb[19].mxu0  ;;  %1039 = vmatprep.subr.bf16.mxu0 %v1125_v56  ;;  %1069 = vmatprep.subr.bf16.mxu1 %v1125_v56 }
 0x13b   :  { %v1040_v24 = vpack.c.bf16 %v961_v22, %v346_v23  ;;  %v470_v22 = vld [vmem:[#allocation5 + $0xb8] sm:$0xff]  ;;  %v493_v23 = vld [vmem:[#allocation5 + $0x170] sm:$0xff] }
 0x13d   :  { %v964_v25 = vpop.f32.mrb[20].mxu0  ;;  %1041 = vmatpush1.bf16.msra.mxu0 %v1040_v24  ;;  %1085 = vmatpush1.bf16.msra.mxu1 %v1040_v24  ;;  %v469_v24 = vld [vmem:[#allocation5 + $0xb0] sm:$0xff] }
 0x13e   :  { %v356_v26 = vpop.f32.mrb[21].mxu0  ;;  %1042 = vmatprep.subr.bf16.mxu0 %v1125_v56  ;;  %1070 = vmatprep.subr.bf16.mxu1 %v1125_v56 }
 0x13f   :  { %v1043_v27 = vpack.c.bf16 %v964_v25, %v356_v26  ;;  %v496_v25 = vld [vmem:[#allocation5 + $0x188] sm:$0xff]  ;;  %v495_v26 = vld [vmem:[#allocation5 + $0x180] sm:$0xff] }
 0x141   :  { %v967_v28 = vpop.f32.mrb[22].mxu0  ;;  %1044 = vmatpush1.bf16.msra.mxu0 %v1043_v27  ;;  %1086 = vmatpush1.bf16.msra.mxu1 %v1043_v27  ;;  %v498_v27 = vld [vmem:[#allocation5 + $0x198] sm:$0xff] }
 0x142   :  { %v366_v29 = vpop.f32.mrb[23].mxu0  ;;  %1045 = vmatprep.subr.bf16.mxu0 %v1125_v56  ;;  %1071 = vmatprep.subr.bf16.mxu1 %v1125_v56 }
 0x143   :  { %v1046_v30 = vpack.c.bf16 %v967_v28, %v366_v29  ;;  %v497_v28 = vld [vmem:[#allocation5 + $0x190] sm:$0xff]  ;;  %v500_v29 = vld [vmem:[#allocation5 + $0x1a8] sm:$0xff] }
 0x145   :  { %v970_v31 = vpop.f32.mrb[24].mxu0  ;;  %1047 = vmatpush1.bf16.msra.mxu0 %v1046_v30  ;;  %1087 = vmatpush1.bf16.msra.mxu1 %v1046_v30  ;;  %v499_v30 = vld [vmem:[#allocation5 + $0x1a0] sm:$0xff] }
 0x146   :  { %v376_v32 = vpop.f32.mrb[25].mxu0  ;;  %1048 = vmatprep.subr.bf16.mxu0 %v1125_v56  ;;  %1072 = vmatprep.subr.bf16.mxu1 %v1125_v56 }
 0x147   :  { %v1049_v33 = vpack.c.bf16 %v970_v31, %v376_v32  ;;  %v502_v31 = vld [vmem:[#allocation5 + $0x1b8] sm:$0xff]  ;;  %v501_v32 = vld [vmem:[#allocation5 + $0x1b0] sm:$0xff] }
 0x149   :  { %v973_v34 = vpop.f32.mrb[26].mxu0  ;;  %1050 = vmatpush1.bf16.msra.mxu0 %v1049_v33  ;;  %1088 = vmatpush1.bf16.msra.mxu1 %v1049_v33  ;;  %v504_v33 = vld [vmem:[#allocation5 + $0x1c8] sm:$0xff] }
 0x14a   :  { %v386_v35 = vpop.f32.mrb[27].mxu0  ;;  %1051 = vmatprep.subr.bf16.mxu0 %v1125_v56  ;;  %1073 = vmatprep.subr.bf16.mxu1 %v1125_v56 }
 0x14b   :  { %v1052_v36 = vpack.c.bf16 %v973_v34, %v386_v35  ;;  %v503_v34 = vld [vmem:[#allocation5 + $0x1c0] sm:$0xff]  ;;  %v506_v35 = vld [vmem:[#allocation5 + $0x1d8] sm:$0xff] }
 0x14d   :  { %v976_v37 = vpop.f32.mrb[28].mxu0  ;;  %1053 = vmatpush1.bf16.msra.mxu0 %v1052_v36  ;;  %1089 = vmatpush1.bf16.msra.mxu1 %v1052_v36  ;;  %v505_v36 = vld [vmem:[#allocation5 + $0x1d0] sm:$0xff] }
 0x14e   :  { %v396_v38 = vpop.f32.mrb[29].mxu0  ;;  %1054 = vmatprep.subr.bf16.mxu0 %v1125_v56  ;;  %1074 = vmatprep.subr.bf16.mxu1 %v1125_v56 }
 0x14f   :  { %v1055_v39 = vpack.c.bf16 %v976_v37, %v396_v38  ;;  %v508_v37 = vld [vmem:[#allocation5 + $0x1e8] sm:$0xff]  ;;  %v507_v38 = vld [vmem:[#allocation5 + $0x1e0] sm:$0xff] }
 0x151   :  { %v979_v40 = vpop.f32.mrb[30].mxu0  ;;  %1056 = vmatpush1.bf16.msra.mxu0 %v1055_v39  ;;  %1090 = vmatpush1.bf16.msra.mxu1 %v1055_v39  ;;  %v510_v39 = vld [vmem:[#allocation5 + $0x1f8] sm:$0xff] }
 0x152   :  { %v406_v41 = vpop.f32.mrb[31].mxu0  ;;  %1057 = vmatprep.subr.bf16.mxu0 %v1125_v56  ;;  %1075 = vmatprep.subr.bf16.mxu1 %v1125_v56  ;;  %v453_v56 = vld [vmem:[#allocation5 + $0x30] sm:$0xff] }
 0x153   :  { %v1058_v42 = vpack.c.bf16 %v979_v40, %v406_v41  ;;  %v509_v40 = vld [vmem:[#allocation5 + $0x1f0] sm:$0xff] }
 0x155   :  { %1059 = vmatpush1.bf16.msra.mxu0 %v1058_v42  ;;  %1091 = vmatpush1.bf16.msra.mxu1 %v1058_v42 }
 0x158   :  { %668 = vmatmul.mubr.f32.vlgmr.msra.gmra.mrb[0].mxu1 %v471_v43  ;;  %608 = vmatmul.mubr.f32.vlgmr.msra.gmra.mrb[32].mxu0 %v447_v44 }
 0x159   :  { %672 = vmatprep.mubr.f32.mxu1 %v474_v45  ;;  %612 = vmatprep.mubr.f32.mxu0 %v450_v46 }
 0x15c   :  { %673 = vmatmul.mubr.f32.gmra.mrb[2].mxu1 %v473_v47  ;;  %613 = vmatmul.mubr.f32.gmra.mrb[34].mxu0 %v449_v48 }
 0x15d   :  { %677 = vmatprep.mubr.f32.mxu1 %v476_v49  ;;  %617 = vmatprep.mubr.f32.mxu0 %v452_v50 }
 0x160   :  { %678 = vmatmul.mubr.f32.gmra.mrb[4].mxu1 %v475_v51  ;;  %618 = vmatmul.mubr.f32.gmra.mrb[36].mxu0 %v451_v52 }
 0x161   :  { %682 = vmatprep.mubr.f32.mxu1 %v478_v53  ;;  %622 = vmatprep.mubr.f32.mxu0 %v454_v54 }
 0x164   :  { %683 = vmatmul.mubr.f32.gmra.mrb[6].mxu1 %v477_v55  ;;  %623 = vmatmul.mubr.f32.gmra.mrb[38].mxu0 %v453_v56 }
 0x165   :  { %687 = vmatprep.mubr.f32.mxu1 %v480_v57  ;;  %627 = vmatprep.mubr.f32.mxu0 %v456_v58 }
 0x168   :  { %688 = vmatmul.mubr.f32.gmra.mrb[8].mxu1 %v479_v59  ;;  %628 = vmatmul.mubr.f32.gmra.mrb[40].mxu0 %v455_v60 }
 0x169   :  { %692 = vmatprep.mubr.f32.mxu1 %v482_v61  ;;  %632 = vmatprep.mubr.f32.mxu0 %v458_v62 }
 0x16c   :  { %693 = vmatmul.mubr.f32.gmra.mrb[10].mxu1 %v481_v63  ;;  %633 = vmatmul.mubr.f32.gmra.mrb[42].mxu0 %v457_v0 }
 0x16d   :  { %697 = vmatprep.mubr.f32.mxu1 %v484_v1  ;;  %637 = vmatprep.mubr.f32.mxu0 %v460_v2 }
 0x170   :  { %698 = vmatmul.mubr.f32.gmra.mrb[12].mxu1 %v483_v3  ;;  %638 = vmatmul.mubr.f32.gmra.mrb[44].mxu0 %v459_v4 }
 0x171   :  { %702 = vmatprep.mubr.f32.mxu1 %v486_v5  ;;  %642 = vmatprep.mubr.f32.mxu0 %v462_v6 }
 0x174   :  { %703 = vmatmul.mubr.f32.gmra.mrb[14].mxu1 %v485_v7  ;;  %643 = vmatmul.mubr.f32.gmra.mrb[46].mxu0 %v461_v8 }
 0x175   :  { %707 = vmatprep.mubr.f32.mxu1 %v488_v9  ;;  %647 = vmatprep.mubr.f32.mxu0 %v464_v10 }
 0x178   :  { %708 = vmatmul.mubr.f32.gmra.mrb[16].mxu1 %v487_v11  ;;  %648 = vmatmul.mubr.f32.gmra.mrb[48].mxu0 %v463_v12 }
 0x179   :  { %712 = vmatprep.mubr.f32.mxu1 %v490_v13  ;;  %652 = vmatprep.mubr.f32.mxu0 %v466_v14 }
 0x17c   :  { %713 = vmatmul.mubr.f32.gmra.mrb[18].mxu1 %v489_v15  ;;  %653 = vmatmul.mubr.f32.gmra.mrb[50].mxu0 %v465_v16 }
 0x17d   :  { %717 = vmatprep.mubr.f32.mxu1 %v492_v17  ;;  %657 = vmatprep.mubr.f32.mxu0 %v468_v18 }
 0x180   :  { %718 = vmatmul.mubr.f32.gmra.mrb[20].mxu1 %v491_v19  ;;  %658 = vmatmul.mubr.f32.gmra.mrb[52].mxu0 %v467_v20 }
 0x181   :  { %722 = vmatprep.mubr.f32.mxu1 %v494_v21  ;;  %662 = vmatprep.mubr.f32.mxu0 %v470_v22 }
 0x184   :  { %723 = vmatmul.mubr.f32.gmra.mrb[22].mxu1 %v493_v23  ;;  %663 = vmatmul.mubr.f32.gmra.mrb[54].mxu0 %v469_v24 }
 0x185   :  { %727 = vmatprep.mubr.f32.mxu1 %v496_v25 }
 0x188   :  { %728 = vmatmul.mubr.f32.gmra.mrb[24].mxu1 %v495_v26 }
 0x189   :  { %732 = vmatprep.mubr.f32.mxu1 %v498_v27 }
 0x18c   :  { %733 = vmatmul.mubr.f32.gmra.mrb[26].mxu1 %v497_v28 }
 0x18d   :  { %737 = vmatprep.mubr.f32.mxu1 %v500_v29 }
 0x190   :  { %738 = vmatmul.mubr.f32.gmra.mrb[28].mxu1 %v499_v30 }
 0x191   :  { %742 = vmatprep.mubr.f32.mxu1 %v502_v31 }
 0x194   :  { %743 = vmatmul.mubr.f32.gmra.mrb[30].mxu1 %v501_v32 }
 0x195   :  { %747 = vmatprep.mubr.f32.mxu1 %v504_v33 }
 0x198   :  { %748 = vmatmul.mubr.f32.gmra.mrb[32].mxu1 %v503_v34 }
 0x199   :  { %752 = vmatprep.mubr.f32.mxu1 %v506_v35 }
 0x19c   :  { %753 = vmatmul.mubr.f32.gmra.mrb[34].mxu1 %v505_v36 }
 0x19d   :  { %757 = vmatprep.mubr.f32.mxu1 %v508_v37 }
 0x1a0   :  { %758 = vmatmul.mubr.f32.gmra.mrb[36].mxu1 %v507_v38 }
 0x1a1   :  { %762 = vmatprep.mubr.f32.mxu1 %v510_v39 }
 0x1a4   :  { %763 = vmatmul.mubr.f32.gmra.mrb[38].mxu1 %v509_v40 }
 0x22b   :  { %v669_v41 = vpop.f32.mrb[0].mxu1  ;;  %v609_v42 = vpop.f32.mrb[32].mxu0 }
 0x22c   :  { %v780_v43 = vmax.f32 %v669_v41, 0.0  ;;  %v671_v44 = vpop.f32.mrb[1].mxu1  ;;  %v768_v45 = vmax.f32 %v609_v42, 0.0  ;;  %v611_v46 = vpop.f32.mrb[33].mxu0 }
 0x22e   :  { %812 = vst [vmem:[%s1526_s3 + $0x60] sm:$0xff] %v780_v43  ;;  %800 = vst [vmem:[%s1526_s3] sm:$0xff] %v768_v45 }
 0x22f   :  { %v674_v47 = vpop.f32.mrb[2].mxu1  ;;  %v614_v48 = vpop.f32.mrb[34].mxu0 }
 0x230   :  { %v781_v49 = vmax.f32 %v674_v47, 0.0  ;;  %v676_v50 = vpop.f32.mrb[3].mxu1  ;;  %v769_v51 = vmax.f32 %v614_v48, 0.0  ;;  %v616_v52 = vpop.f32.mrb[35].mxu0 }
 0x232   :  { %813 = vst [vmem:[%s1526_s3 + $0x68] sm:$0xff] %v781_v49  ;;  %801 = vst [vmem:[%s1526_s3 + $0x8] sm:$0xff] %v769_v51 }
 0x233   :  { %v679_v53 = vpop.f32.mrb[4].mxu1  ;;  %v619_v54 = vpop.f32.mrb[36].mxu0 }
 0x234   :  { %v782_v55 = vmax.f32 %v679_v53, 0.0  ;;  %v681_v56 = vpop.f32.mrb[5].mxu1  ;;  %v770_v57 = vmax.f32 %v619_v54, 0.0  ;;  %v621_v58 = vpop.f32.mrb[37].mxu0 }
 0x236   :  { %814 = vst [vmem:[%s1526_s3 + $0x70] sm:$0xff] %v782_v55  ;;  %802 = vst [vmem:[%s1526_s3 + $0x10] sm:$0xff] %v770_v57 }
 0x237   :  { %v684_v59 = vpop.f32.mrb[6].mxu1  ;;  %v624_v60 = vpop.f32.mrb[38].mxu0 }
 0x238   :  { %v783_v61 = vmax.f32 %v684_v59, 0.0  ;;  %v686_v62 = vpop.f32.mrb[7].mxu1  ;;  %v771_v63 = vmax.f32 %v624_v60, 0.0  ;;  %v626_v0 = vpop.f32.mrb[39].mxu0 }
 0x23a   :  { %815 = vst [vmem:[%s1526_s3 + $0x78] sm:$0xff] %v783_v61  ;;  %803 = vst [vmem:[%s1526_s3 + $0x18] sm:$0xff] %v771_v63 }
 0x23b   :  { %v689_v1 = vpop.f32.mrb[8].mxu1  ;;  %v629_v2 = vpop.f32.mrb[40].mxu0 }
 0x23c   :  { %v784_v3 = vmax.f32 %v689_v1, 0.0  ;;  %v691_v4 = vpop.f32.mrb[9].mxu1  ;;  %v772_v5 = vmax.f32 %v629_v2, 0.0  ;;  %v631_v6 = vpop.f32.mrb[41].mxu0 }
 0x23e   :  { %816 = vst [vmem:[%s1526_s3 + $0x80] sm:$0xff] %v784_v3  ;;  %804 = vst [vmem:[%s1526_s3 + $0x20] sm:$0xff] %v772_v5 }
 0x23f   :  { %v694_v7 = vpop.f32.mrb[10].mxu1  ;;  %v634_v8 = vpop.f32.mrb[42].mxu0 }
 0x240   :  { %v785_v9 = vmax.f32 %v694_v7, 0.0  ;;  %v696_v10 = vpop.f32.mrb[11].mxu1  ;;  %v773_v11 = vmax.f32 %v634_v8, 0.0  ;;  %v636_v12 = vpop.f32.mrb[43].mxu0 }
 0x242   :  { %817 = vst [vmem:[%s1526_s3 + $0x88] sm:$0xff] %v785_v9  ;;  %805 = vst [vmem:[%s1526_s3 + $0x28] sm:$0xff] %v773_v11 }
 0x243   :  { %v699_v13 = vpop.f32.mrb[12].mxu1  ;;  %v639_v14 = vpop.f32.mrb[44].mxu0 }
 0x244   :  { %v786_v15 = vmax.f32 %v699_v13, 0.0  ;;  %v701_v16 = vpop.f32.mrb[13].mxu1  ;;  %v774_v17 = vmax.f32 %v639_v14, 0.0  ;;  %v641_v18 = vpop.f32.mrb[45].mxu0 }
 0x246   :  { %818 = vst [vmem:[%s1526_s3 + $0x90] sm:$0xff] %v786_v15  ;;  %806 = vst [vmem:[%s1526_s3 + $0x30] sm:$0xff] %v774_v17 }
 0x247   :  { %v704_v19 = vpop.f32.mrb[14].mxu1  ;;  %v644_v20 = vpop.f32.mrb[46].mxu0 }
 0x248   :  { %v787_v21 = vmax.f32 %v704_v19, 0.0  ;;  %v706_v22 = vpop.f32.mrb[15].mxu1  ;;  %v775_v23 = vmax.f32 %v644_v20, 0.0  ;;  %v646_v24 = vpop.f32.mrb[47].mxu0 }
 0x24a   :  { %819 = vst [vmem:[%s1526_s3 + $0x98] sm:$0xff] %v787_v21  ;;  %807 = vst [vmem:[%s1526_s3 + $0x38] sm:$0xff] %v775_v23 }
 0x24b   :  { %v709_v25 = vpop.f32.mrb[16].mxu1  ;;  %v649_v26 = vpop.f32.mrb[48].mxu0 }
 0x24c   :  { %v788_v27 = vmax.f32 %v709_v25, 0.0  ;;  %v711_v28 = vpop.f32.mrb[17].mxu1  ;;  %v776_v29 = vmax.f32 %v649_v26, 0.0  ;;  %v651_v30 = vpop.f32.mrb[49].mxu0 }
 0x24e   :  { %820 = vst [vmem:[%s1526_s3 + $0xa0] sm:$0xff] %v788_v27  ;;  %808 = vst [vmem:[%s1526_s3 + $0x40] sm:$0xff] %v776_v29 }
 0x24f   :  { %v714_v31 = vpop.f32.mrb[18].mxu1  ;;  %v654_v32 = vpop.f32.mrb[50].mxu0 }
 0x250   :  { %v789_v33 = vmax.f32 %v714_v31, 0.0  ;;  %v716_v34 = vpop.f32.mrb[19].mxu1  ;;  %v777_v35 = vmax.f32 %v654_v32, 0.0  ;;  %v656_v36 = vpop.f32.mrb[51].mxu0 }
 0x252   :  { %821 = vst [vmem:[%s1526_s3 + $0xa8] sm:$0xff] %v789_v33  ;;  %809 = vst [vmem:[%s1526_s3 + $0x48] sm:$0xff] %v777_v35 }
 0x253   :  { %v719_v37 = vpop.f32.mrb[20].mxu1  ;;  %v659_v38 = vpop.f32.mrb[52].mxu0 }
 0x254   :  { %v790_v39 = vmax.f32 %v719_v37, 0.0  ;;  %v721_v40 = vpop.f32.mrb[21].mxu1  ;;  %v778_v41 = vmax.f32 %v659_v38, 0.0  ;;  %v661_v42 = vpop.f32.mrb[53].mxu0 }
 0x256   :  { %822 = vst [vmem:[%s1526_s3 + $0xb0] sm:$0xff] %v790_v39  ;;  %810 = vst [vmem:[%s1526_s3 + $0x50] sm:$0xff] %v778_v41 }
 0x257   :  { %v724_v43 = vpop.f32.mrb[22].mxu1  ;;  %v664_v44 = vpop.f32.mrb[54].mxu0 }
 0x258   :  { %v791_v45 = vmax.f32 %v724_v43, 0.0  ;;  %v726_v46 = vpop.f32.mrb[23].mxu1  ;;  %v779_v47 = vmax.f32 %v664_v44, 0.0  ;;  %v666_v48 = vpop.f32.mrb[55].mxu0 }
 0x25a   :  { %823 = vst [vmem:[%s1526_s3 + $0xb8] sm:$0xff] %v791_v45  ;;  %811 = vst [vmem:[%s1526_s3 + $0x58] sm:$0xff] %v779_v47 }
 0x25b   :  { %v729_v49 = vpop.f32.mrb[24].mxu1 }
 0x25c   :  { %v792_v50 = vmax.f32 %v729_v49, 0.0  ;;  %v731_v51 = vpop.f32.mrb[25].mxu1 }
 0x25e   :  { %824 = vst [vmem:[%s1526_s3 + $0xc0] sm:$0xff] %v792_v50 }
 0x25f   :  { %v734_v52 = vpop.f32.mrb[26].mxu1 }
 0x260   :  { %v793_v53 = vmax.f32 %v734_v52, 0.0  ;;  %v736_v54 = vpop.f32.mrb[27].mxu1 }
 0x262   :  { %825 = vst [vmem:[%s1526_s3 + $0xc8] sm:$0xff] %v793_v53 }
 0x263   :  { %v739_v55 = vpop.f32.mrb[28].mxu1 }
 0x264   :  { %v794_v56 = vmax.f32 %v739_v55, 0.0  ;;  %v741_v57 = vpop.f32.mrb[29].mxu1 }
 0x266   :  { %826 = vst [vmem:[%s1526_s3 + $0xd0] sm:$0xff] %v794_v56 }
 0x267   :  { %v744_v58 = vpop.f32.mrb[30].mxu1 }
 0x268   :  { %v795_v59 = vmax.f32 %v744_v58, 0.0  ;;  %v746_v60 = vpop.f32.mrb[31].mxu1 }
 0x26a   :  { %827 = vst [vmem:[%s1526_s3 + $0xd8] sm:$0xff] %v795_v59 }
 0x26b   :  { %v749_v61 = vpop.f32.mrb[32].mxu1 }
 0x26c   :  { %v796_v62 = vmax.f32 %v749_v61, 0.0  ;;  %v751_v63 = vpop.f32.mrb[33].mxu1 }
 0x26e   :  { %828 = vst [vmem:[%s1526_s3 + $0xe0] sm:$0xff] %v796_v62 }
 0x26f   :  { %v754_v0 = vpop.f32.mrb[34].mxu1 }
 0x270   :  { %v797_v1 = vmax.f32 %v754_v0, 0.0  ;;  %v756_v2 = vpop.f32.mrb[35].mxu1 }
 0x272   :  { %829 = vst [vmem:[%s1526_s3 + $0xe8] sm:$0xff] %v797_v1 }
 0x273   :  { %v759_v3 = vpop.f32.mrb[36].mxu1 }
 0x274   :  { %v798_v4 = vmax.f32 %v759_v3, 0.0  ;;  %v761_v5 = vpop.f32.mrb[37].mxu1 }
 0x276   :  { %830 = vst [vmem:[%s1526_s3 + $0xf0] sm:$0xff] %v798_v4 }
 0x277   :  { %v764_v6 = vpop.f32.mrb[38].mxu1 }
 0x278   :  { %v799_v7 = vmax.f32 %v764_v6, 0.0  ;;  %v766_v8 = vpop.f32.mrb[39].mxu1 }
 0x27a   :  { %831 = vst [vmem:[%s1526_s3 + $0xf8] sm:$0xff] %v799_v7 }
 0x27b   :  { %836 = vsyncpa [#allocation6], 1 }
 0x27c   :  { %837 = vsyncmov [#allocation4] }
 0x27f   :  { %s838_s12 = vpop.sfrf %837 }
 0x280   :  { %p851_p8 = scmp.ne.s32.totalorder %s838_s12, 0 }
 0x282   :  { %842 = shalt.err (%p851_p8)  }

</bundles_post_ra>
